<compile_context>
chip_gen: v6e
topology: v6e:2x2x1
jax: 0.10.0
libtpu: 0.0.40
codegen_flags: <defaults>
</compile_context>

<pallas_src>
import functools
import math

import jax
import jax.numpy as jnp
from jax.experimental import pallas as pl
from jax.experimental.pallas import tpu as pltpu

BF16 = jnp.bfloat16
LN_EPS = 1e-5


# ----------------------------------------------------------------------------
# Small helpers
# ----------------------------------------------------------------------------
def _round_up(n, m):
    return (n + m - 1) // m * m


def _vmem_limit_bytes():
    """Generation-aware VMEM limit (~75% of physical, clamped to [32, 100] MiB)."""
    cap = 64 * 1024 * 1024
    try:
        info = pltpu.get_tpu_info()
        cap = int(getattr(info, "vmem_capacity_bytes", cap))
    except Exception:
        pass
    return max(32 * 1024 * 1024, min(cap * 3 // 4, 100 * 1024 * 1024))


def _pick_batch_shards(B, T):
    # Use the second v7x TensorCore only when each shard still has >=128 matmul
    # rows: filling the MXU M dimension takes priority over core parallelism.
    if B % 2 == 0 and (B // 2) * T >= 128:
        return 2
    return 1


# ----------------------------------------------------------------------------
# In-kernel math helpers
# ----------------------------------------------------------------------------
def _erf(x):
    # Abramowitz & Stegun 7.1.26 rational approximation (|err| <= ~1.5e-7 exact;
    # the approx reciprocal adds <1e-3).  exp lands on the EUP, reciprocal too.
    a1, a2, a3, a4, a5 = 0.254829592, -0.284496736, 1.421413741, -1.453152027, 1.061405429
    p = 0.3275911
    s = jnp.where(x >= 0.0, 1.0, -1.0)
    z = jnp.abs(x)
    t = pl.reciprocal(1.0 + p * z, approx=True)
    poly = ((((a5 * t + a4) * t + a3) * t + a2) * t + a1) * t
    return s * (1.0 - poly * jnp.exp(-z * z))


def _gelu_exact(x):
    # torch.nn.GELU() default: erf-based GELU.
    return 0.5 * x * (1.0 + _erf(x * (1.0 / math.sqrt(2.0))))


def _layernorm(x, g, b):
    mean = jnp.mean(x, axis=-1, keepdims=True)
    var = jnp.mean((x - mean) ** 2, axis=-1, keepdims=True)  # biased, like PyTorch
    return (x - mean) * jax.lax.rsqrt(var + LN_EPS) * g + b


# ----------------------------------------------------------------------------
# Fused full-stack transformer kernel
#   grid = (batch_shards [parallel], n_layer [arbitrary])
#   Activation lives in the output VMEM block across the layer axis.
# ----------------------------------------------------------------------------
def _stack_kernel(x_ref, wqkv_ref, bqkv_ref, wo_ref, bo_ref,
                  ln2g_ref, ln2b_ref, w1_ref, b1_ref, w2_ref, b2_ref,
                  o_ref, *, n_head):
    layer = pl.program_id(1)

    @pl.when(layer == 0)
    def _():
        o_ref[...] = x_ref[...]          # seed the resident activation for this shard

    Bc, T, D = o_ref.shape
    hd = D // n_head
    M = Bc * T

    xf = o_ref[...].reshape(M, D)        # resident activation, f32, M = Bc*T rows

    # --- qkv projection (bf16 MXU operands, f32 accumulate; scale pre-folded) ---
    qkv = jnp.dot(xf.astype(BF16), wqkv_ref[...],
                  preferred_element_type=jnp.float32) + bqkv_ref[...]      # (M, 3D)
    qkv_b = qkv.reshape(Bc, T, 3 * D)

    # --- multi-head self-attention; out_proj accumulated per head (no concat) ---
    acc = jnp.zeros((M, D), jnp.float32)
    for h in range(n_head):
        q = qkv_b[:, :, h * hd:(h + 1) * hd].astype(BF16)                  # (Bc,T,hd)
        k = qkv_b[:, :, D + h * hd:D + (h + 1) * hd].astype(BF16)
        v = qkv_b[:, :, 2 * D + h * hd:2 * D + (h + 1) * hd].astype(BF16)
        s = jnp.einsum('bqd,bkd->bqk', q, k,
                       preferred_element_type=jnp.float32)                 # (Bc,T,T)
        m = jnp.max(s, axis=-1, keepdims=True)
        p = jnp.exp(s - m)
        p = p * pl.reciprocal(jnp.sum(p, axis=-1, keepdims=True), approx=True)
        ho = jnp.einsum('bqk,bkd->bqd', p.astype(BF16), v,
                        preferred_element_type=jnp.float32)                # (Bc,T,hd)
        acc = acc + jnp.dot(ho.reshape(M, hd).astype(BF16),
                            wo_ref[h * hd:(h + 1) * hd, :],
                            preferred_element_type=jnp.float32)            # (M, D)
    x1 = xf + acc + bo_ref[...]

    # --- pre-LN (ln2) + FFN (GELU) + residual ---
    h_norm = _layernorm(x1, ln2g_ref[...], ln2b_ref[...])
    hid = jnp.dot(h_norm.astype(BF16), w1_ref[...],
                  preferred_element_type=jnp.float32) + b1_ref[...]        # (M, 4D)
    hid = _gelu_exact(hid)
    y = jnp.dot(hid.astype(BF16), w2_ref[...],
                preferred_element_type=jnp.float32) + b2_ref[...]          # (M, D)

    o_ref[...] = (x1 + y).reshape(Bc, T, D)


def transformer_stack_forward(x, stack, *, n_head):
    """x: (B, T, D) f32 -> (B, T, D) f32.  Whole layer stack in one pallas_call."""
    B, T, D = x.shape
    L = stack["wqkv"].shape[0]
    n_shards = _pick_batch_shards(B, T)
    Bc = B // n_shards

    x_spec = pl.BlockSpec((Bc, T, D), lambda s, l: (s, 0, 0))

    def layer_spec(arr):
        nd = arr.ndim - 1
        return pl.BlockSpec((None,) + arr.shape[1:],
                            lambda s, l, _nd=nd: (l,) + (0,) * _nd)

    operands = (x, stack["wqkv"], stack["bqkv"], stack["wo"], stack["bo"],
                stack["ln2_g"], stack["ln2_b"], stack["w1"], stack["b1"],
                stack["w2"], stack["b2"])
    in_specs = [x_spec] + [layer_spec(a) for a in operands[1:]]

    return pl.pallas_call(
        functools.partial(_stack_kernel, n_head=n_head),
        out_shape=jax.ShapeDtypeStruct((B, T, D), jnp.float32),
        grid=(n_shards, L),
        in_specs=in_specs,
        out_specs=x_spec,
        input_output_aliases={0: 0},              # output reuses the x buffer
        compiler_params=pltpu.CompilerParams(
            dimension_semantics=("parallel", "arbitrary"),
            vmem_limit_bytes=_vmem_limit_bytes()),
    )(*operands)


# ----------------------------------------------------------------------------
# Fused final LayerNorm + lm-head (no bias), vocab-tiled
# ----------------------------------------------------------------------------
def _lnf_head_kernel(x_ref, g_ref, b_ref, w_ref, o_ref):
    # LayerNorm is recomputed per vocab tile (cheap relative to the matmul).
    y = _layernorm(x_ref[...], g_ref[...], b_ref[...])
    o_ref[...] = jnp.dot(y.astype(BF16), w_ref[...],
                         preferred_element_type=jnp.float32)


def pallas_lnf_head(x, g, b, w, *, v_tile=512):
    # TODO(synk): for very large B*T also tile the M axis (fine for small M here).
    M, D = x.shape
    V = w.shape[1]
    Vt = min(v_tile, _round_up(V, 128))           # lane-dense multiple-of-128 tiles
    Vp = _round_up(V, Vt)
    if Vp != V:
        w = jnp.pad(w, ((0, 0), (0, Vp - V)))

    out = pl.pallas_call(
        _lnf_head_kernel,
        out_shape=jax.ShapeDtypeStruct((M, Vp), jnp.float32),
        grid=(Vp // Vt,),
        in_specs=[pl.BlockSpec((M, D), lambda j: (0, 0)),
                  pl.BlockSpec((1, D), lambda j: (0, 0)),
                  pl.BlockSpec((1, D), lambda j: (0, 0)),
                  pl.BlockSpec((D, Vt), lambda j: (0, j))],
        out_specs=pl.BlockSpec((M, Vt), lambda j: (0, j)),
        compiler_params=pltpu.CompilerParams(
            dimension_semantics=("parallel",),
            vmem_limit_bytes=_vmem_limit_bytes()),
    )(x, g, b, w)
    return out[:, :V] if Vp != V else out


# ----------------------------------------------------------------------------
# Model
# ----------------------------------------------------------------------------
@functools.partial(jax.jit, static_argnames=("block_size", "n_head"))
def tiny_transformer_forward(idx, params, *, block_size, n_head):
    B, T = idx.shape
    if T > block_size:
        idx = idx[:, :block_size]
        T = block_size
    # Embedding gathers are irregular; done in plain JAX (glue, fused by XLA).
    tok_emb = jnp.take(params["token_emb"], idx, axis=0)                   # (B,T,D)
    pos = jnp.clip(jnp.arange(T, dtype=jnp.int32), 0, block_size - 1)
    pos_emb = jnp.take(params["pos_emb"], pos, axis=0)                     # (T,D)
    x = tok_emb + pos_emb[None]                                            # dropout = id (eval)

    x = transformer_stack_forward(x, params["stack"], n_head=n_head)

    D = x.shape[-1]
    logits = pallas_lnf_head(x.reshape(B * T, D),
                             params["ln_f_g"], params["ln_f_b"], params["head_w"])
    return logits.reshape(B, T, -1)


def init_params(key, *, vocab_size, block_size, n_embd, n_layer, n_head):
    # Deterministic synthetic init matching the PyTorch module's _init_weights
    # (normal std=0.02 weights, zero biases, ones/zeros LayerNorm).  Linear weights
    # are stored pre-transposed (D_in, D_out) and stacked over layers; matmul
    # weights in bf16 (MXU operands), biases / LN / embeddings in f32.
    # ln1 exists in the module but is never used by forward -> omitted on purpose.
    hd = n_embd // n_head
    scale = 1.0 / math.sqrt(hd)
    ks = jax.random.split(key, 7)

    def nrm(k, shape, dtype=jnp.float32):
        return (0.02 * jax.random.normal(k, shape, jnp.float32)).astype(dtype)

    # Fold the 1/sqrt(head_dim) attention scale into the q projection columns.
    wqkv = 0.02 * jax.random.normal(ks[2], (n_layer, n_embd, 3 * n_embd), jnp.float32)
    wqkv = wqkv.at[:, :, :n_embd].multiply(scale)
    bqkv = jnp.zeros((n_layer, 1, 3 * n_embd), jnp.float32)
    bqkv = bqkv.at[:, :, :n_embd].multiply(scale)   # no-op for zero bias; kept for generality

    return {
        "token_emb": nrm(ks[0], (vocab_size, n_embd)),
        "pos_emb": nrm(ks[1], (block_size, n_embd)),
        "ln_f_g": jnp.ones((1, n_embd), jnp.float32),
        "ln_f_b": jnp.zeros((1, n_embd), jnp.float32),
        "head_w": nrm(ks[6], (n_embd, vocab_size), BF16),      # head.weight.T, no bias
        "stack": {
            "wqkv": wqkv.astype(BF16),                           # in_proj_weight.T, q-scaled
            "bqkv": bqkv,
            "wo": nrm(ks[3], (n_layer, n_embd, n_embd), BF16),   # out_proj.weight.T
            "bo": jnp.zeros((n_layer, 1, n_embd), jnp.float32),
            "ln2_g": jnp.ones((n_layer, 1, n_embd), jnp.float32),
            "ln2_b": jnp.zeros((n_layer, 1, n_embd), jnp.float32),
            "w1": nrm(ks[4], (n_layer, n_embd, 4 * n_embd), BF16),
            "b1": jnp.zeros((n_layer, 1, 4 * n_embd), jnp.float32),
            "w2": nrm(ks[5], (n_layer, 4 * n_embd, n_embd), BF16),
            "b2": jnp.zeros((n_layer, 1, n_embd), jnp.float32),
        },
    }


if __name__ == "__main__":
    # Small config consistent with the module (n_embd divisible by n_head).
    cfg = dict(vocab_size=100, block_size=16, n_embd=128, n_layer=2, n_head=4)
    B, T = 2, 8

    key = jax.random.PRNGKey(0)
    pkey, ikey = jax.random.split(key)
    params = init_params(pkey, **cfg)
    idx = jax.random.randint(ikey, (B, T), 0, cfg["vocab_size"], dtype=jnp.int32)

    logits = tiny_transformer_forward(idx, params,
                                      block_size=cfg["block_size"],
                                      n_head=cfg["n_head"])
    jax.block_until_ready(logits)
    assert logits.shape == (B, T, cfg["vocab_size"]), logits.shape
    assert bool(jnp.all(jnp.isfinite(logits)))
    # TODO(synk): dropout is stochastic in train mode; implemented as identity (eval).
    print("KERNEL_OK")
</pallas_src>

<mosaic_0001>
module attributes {stable_mosaic.version = 11 : i64} {
  func.func @_stack_kernel(%arg0: i32, %arg1: i32, %arg2: memref<2x8x128xf32, #tpu.memory_space<vmem>>, %arg3: memref<1x128x384xbf16, #tpu.memory_space<vmem>>, %arg4: memref<1x1x384xf32, #tpu.memory_space<vmem>>, %arg5: memref<1x128x128xbf16, #tpu.memory_space<vmem>>, %arg6: memref<1x1x128xf32, #tpu.memory_space<vmem>>, %arg7: memref<1x1x128xf32, #tpu.memory_space<vmem>>, %arg8: memref<1x1x128xf32, #tpu.memory_space<vmem>>, %arg9: memref<1x128x512xbf16, #tpu.memory_space<vmem>>, %arg10: memref<1x1x512xf32, #tpu.memory_space<vmem>>, %arg11: memref<1x512x128xbf16, #tpu.memory_space<vmem>>, %arg12: memref<1x1x128xf32, #tpu.memory_space<vmem>>, %arg13: memref<2x8x128xf32, #tpu.memory_space<vmem>>) attributes {dimension_semantics = [#tpu.dimension_semantics<parallel>, #tpu.dimension_semantics<arbitrary>], iteration_bounds = array<i64: 1, 2>, scalar_prefetch = 0 : i64, scratch_operands = 0 : i64, tpu.core_type = #tpu.core_type<tc>, window_params = [{transform_indices = @transform_0, window_bounds = array<i64: 2, 8, 128>}, {transform_indices = @transform_1, window_bounds = array<i64: 1, 128, 384>}, {transform_indices = @transform_2, window_bounds = array<i64: 1, 1, 384>}, {transform_indices = @transform_3, window_bounds = array<i64: 1, 128, 128>}, {transform_indices = @transform_4, window_bounds = array<i64: 1, 1, 128>}, {transform_indices = @transform_5, window_bounds = array<i64: 1, 1, 128>}, {transform_indices = @transform_6, window_bounds = array<i64: 1, 1, 128>}, {transform_indices = @transform_7, window_bounds = array<i64: 1, 128, 512>}, {transform_indices = @transform_8, window_bounds = array<i64: 1, 1, 512>}, {transform_indices = @transform_9, window_bounds = array<i64: 1, 512, 128>}, {transform_indices = @transform_10, window_bounds = array<i64: 1, 1, 128>}, {transform_indices = @transform_11, window_bounds = array<i64: 2, 8, 128>}]} {
    %c0_i32 = arith.constant 0 : i32
    %0 = arith.cmpi eq, %arg1, %c0_i32 : i32
    %1 = arith.extui %0 : i1 to i32
    %c0_i32_0 = arith.constant 0 : i32
    %2 = arith.cmpi ne, %1, %c0_i32_0 : i32
    scf.if %2 {
      %c0_85 = arith.constant 0 : index
      %c0_86 = arith.constant 0 : index
      %c0_87 = arith.constant 0 : index
      %205 = vector.load %arg2[%c0_85, %c0_86, %c0_87] : memref<2x8x128xf32, #tpu.memory_space<vmem>>, vector<2x8x128xf32>
      %c0_88 = arith.constant 0 : index
      %c0_89 = arith.constant 0 : index
      %c0_90 = arith.constant 0 : index
      %206 = vector.load %arg13[%c0_88, %c0_89, %c0_90] : memref<2x8x128xf32, #tpu.memory_space<vmem>>, vector<2x8x128xf32>
      tpu.vector_store %arg13[%c0_88, %c0_89, %c0_90], %205 {strides = array<i32>} : memref<2x8x128xf32, #tpu.memory_space<vmem>>, vector<2x8x128xf32>,
    } else {
    }
    %c0 = arith.constant 0 : index
    %c0_1 = arith.constant 0 : index
    %c0_2 = arith.constant 0 : index
    %3 = vector.load %arg13[%c0, %c0_1, %c0_2] : memref<2x8x128xf32, #tpu.memory_space<vmem>>, vector<2x8x128xf32>
    %4 = vector.shape_cast %3 : vector<2x8x128xf32> to vector<16x128xf32>
    %5 = arith.truncf %4 : vector<16x128xf32> to vector<16x128xbf16>
    %c0_3 = arith.constant 0 : index
    %c0_4 = arith.constant 0 : index
    %c0_5 = arith.constant 0 : index
    %6 = vector.load %arg3[%c0_3, %c0_4, %c0_5] : memref<1x128x384xbf16, #tpu.memory_space<vmem>>, vector<1x128x384xbf16>
    %7 = vector.shape_cast %6 : vector<1x128x384xbf16> to vector<128x384xbf16>
    %cst = arith.constant dense<0.000000e+00> : vector<16x384xf32>
    %8 = tpu.matmul %5, %7, %cst {dimension_numbers = #tpu.dot_dimension_numbers<[1], [0], [0], [1], [0, 0, 1, 1], [], []>} : vector<16x128xbf16>, vector<128x384xbf16>, vector<16x384xf32> -> vector<16x384xf32>
    %c0_6 = arith.constant 0 : index
    %c0_7 = arith.constant 0 : index
    %c0_8 = arith.constant 0 : index
    %9 = vector.load %arg4[%c0_6, %c0_7, %c0_8] : memref<1x1x384xf32, #tpu.memory_space<vmem>>, vector<1x1x384xf32>
    %10 = vector.shape_cast %9 : vector<1x1x384xf32> to vector<1x384xf32>
    %11 = vector.broadcast %10 : vector<1x384xf32> to vector<16x384xf32>
    %12 = arith.addf %8, %11 : vector<16x384xf32>
    %13 = vector.shape_cast %12 : vector<16x384xf32> to vector<2x8x384xf32>
    %cst_9 = arith.constant 0.000000e+00 : f32
    %14 = vector.broadcast %cst_9 : f32 to vector<16x128xf32>
    %15 = vector.extract_strided_slice %13 {offsets = [0, 0, 0], sizes = [2, 8, 32], strides = [1, 1, 1]} : vector<2x8x384xf32> to vector<2x8x32xf32>
    %16 = arith.truncf %15 : vector<2x8x32xf32> to vector<2x8x32xbf16>
    %17 = vector.extract_strided_slice %13 {offsets = [0, 0, 128], sizes = [2, 8, 32], strides = [1, 1, 1]} : vector<2x8x384xf32> to vector<2x8x32xf32>
    %18 = arith.truncf %17 : vector<2x8x32xf32> to vector<2x8x32xbf16>
    %19 = vector.extract_strided_slice %13 {offsets = [0, 0, 256], sizes = [2, 8, 32], strides = [1, 1, 1]} : vector<2x8x384xf32> to vector<2x8x32xf32>
    %20 = arith.truncf %19 : vector<2x8x32xf32> to vector<2x8x32xbf16>
    "tpu.trace_start"() <{level = 10 : i32, message = "bqd,bkd->bqk"}> : () -> ()
    %cst_10 = arith.constant dense<0.000000e+00> : vector<2x8x8xf32>
    %21 = tpu.matmul %16, %18, %cst_10 {dimension_numbers = #tpu.dot_dimension_numbers<[2], [2], [1], [1], [0, 0, 0, 1, 1, 1], [0], [0]>} : vector<2x8x32xbf16>, vector<2x8x32xbf16>, vector<2x8x8xf32> -> vector<2x8x8xf32>
    "tpu.trace_stop"() : () -> ()
    %cst_11 = arith.constant dense<0xFF800000> : vector<2x8xf32>
    %22 = vector.multi_reduction <maximumf>, %21, %cst_11 [2] : vector<2x8x8xf32> to vector<2x8xf32>
    %23 = vector.shape_cast %22 : vector<2x8xf32> to vector<2x8x1xf32>
    %24 = vector.broadcast %23 : vector<2x8x1xf32> to vector<2x8x8xf32>
    %25 = arith.subf %21, %24 : vector<2x8x8xf32>
    %26 = math.exp %25 : vector<2x8x8xf32>
    %cst_12 = arith.constant dense<0.000000e+00> : vector<2x8xf32>
    %27 = vector.multi_reduction <add>, %26, %cst_12 [2] : vector<2x8x8xf32> to vector<2x8xf32>
    %28 = vector.shape_cast %27 : vector<2x8xf32> to vector<2x8x1xf32>
    %29 = tpu.reciprocal %28 {approx = true} : vector<2x8x1xf32> -> vector<2x8x1xf32>
    %30 = vector.broadcast %29 : vector<2x8x1xf32> to vector<2x8x8xf32>
    %31 = arith.mulf %26, %30 : vector<2x8x8xf32>
    %32 = arith.truncf %31 : vector<2x8x8xf32> to vector<2x8x8xbf16>
    "tpu.trace_start"() <{level = 10 : i32, message = "bqk,bkd->bqd"}> : () -> ()
    %cst_13 = arith.constant dense<0.000000e+00> : vector<2x8x32xf32>
    %33 = tpu.matmul %32, %20, %cst_13 {dimension_numbers = #tpu.dot_dimension_numbers<[2], [1], [1], [2], [0, 0, 0, 1, 1, 2], [0], [0]>} : vector<2x8x8xbf16>, vector<2x8x32xbf16>, vector<2x8x32xf32> -> vector<2x8x32xf32>
    "tpu.trace_stop"() : () -> ()
    %34 = vector.shape_cast %33 : vector<2x8x32xf32> to vector<16x32xf32>
    %35 = arith.truncf %34 : vector<16x32xf32> to vector<16x32xbf16>
    %c0_14 = arith.constant 0 : index
    %c0_15 = arith.constant 0 : index
    %c0_16 = arith.constant 0 : index
    %36 = vector.load %arg5[%c0_14, %c0_15, %c0_16] : memref<1x128x128xbf16, #tpu.memory_space<vmem>>, vector<1x32x128xbf16>
    %37 = vector.shape_cast %36 : vector<1x32x128xbf16> to vector<32x128xbf16>
    %cst_17 = arith.constant dense<0.000000e+00> : vector<16x128xf32>
    %38 = tpu.matmul %35, %37, %cst_17 {dimension_numbers = #tpu.dot_dimension_numbers<[1], [0], [0], [1], [0, 0, 1, 1], [], []>} : vector<16x32xbf16>, vector<32x128xbf16>, vector<16x128xf32> -> vector<16x128xf32>
    %39 = arith.addf %14, %38 : vector<16x128xf32>
    %40 = vector.extract_strided_slice %13 {offsets = [0, 0, 32], sizes = [2, 8, 32], strides = [1, 1, 1]} : vector<2x8x384xf32> to vector<2x8x32xf32>
    %41 = arith.truncf %40 : vector<2x8x32xf32> to vector<2x8x32xbf16>
    %42 = vector.extract_strided_slice %13 {offsets = [0, 0, 160], sizes = [2, 8, 32], strides = [1, 1, 1]} : vector<2x8x384xf32> to vector<2x8x32xf32>
    %43 = arith.truncf %42 : vector<2x8x32xf32> to vector<2x8x32xbf16>
    %44 = vector.extract_strided_slice %13 {offsets = [0, 0, 288], sizes = [2, 8, 32], strides = [1, 1, 1]} : vector<2x8x384xf32> to vector<2x8x32xf32>
    %45 = arith.truncf %44 : vector<2x8x32xf32> to vector<2x8x32xbf16>
    "tpu.trace_start"() <{level = 10 : i32, message = "bqd,bkd->bqk"}> : () -> ()
    %cst_18 = arith.constant dense<0.000000e+00> : vector<2x8x8xf32>
    %46 = tpu.matmul %41, %43, %cst_18 {dimension_numbers = #tpu.dot_dimension_numbers<[2], [2], [1], [1], [0, 0, 0, 1, 1, 1], [0], [0]>} : vector<2x8x32xbf16>, vector<2x8x32xbf16>, vector<2x8x8xf32> -> vector<2x8x8xf32>
    "tpu.trace_stop"() : () -> ()
    %cst_19 = arith.constant dense<0xFF800000> : vector<2x8xf32>
    %47 = vector.multi_reduction <maximumf>, %46, %cst_19 [2] : vector<2x8x8xf32> to vector<2x8xf32>
    %48 = vector.shape_cast %47 : vector<2x8xf32> to vector<2x8x1xf32>
    %49 = vector.broadcast %48 : vector<2x8x1xf32> to vector<2x8x8xf32>
    %50 = arith.subf %46, %49 : vector<2x8x8xf32>
    %51 = math.exp %50 : vector<2x8x8xf32>
    %cst_20 = arith.constant dense<0.000000e+00> : vector<2x8xf32>
    %52 = vector.multi_reduction <add>, %51, %cst_20 [2] : vector<2x8x8xf32> to vector<2x8xf32>
    %53 = vector.shape_cast %52 : vector<2x8xf32> to vector<2x8x1xf32>
    %54 = tpu.reciprocal %53 {approx = true} : vector<2x8x1xf32> -> vector<2x8x1xf32>
    %55 = vector.broadcast %54 : vector<2x8x1xf32> to vector<2x8x8xf32>
    %56 = arith.mulf %51, %55 : vector<2x8x8xf32>
    %57 = arith.truncf %56 : vector<2x8x8xf32> to vector<2x8x8xbf16>
    "tpu.trace_start"() <{level = 10 : i32, message = "bqk,bkd->bqd"}> : () -> ()
    %cst_21 = arith.constant dense<0.000000e+00> : vector<2x8x32xf32>
    %58 = tpu.matmul %57, %45, %cst_21 {dimension_numbers = #tpu.dot_dimension_numbers<[2], [1], [1], [2], [0, 0, 0, 1, 1, 2], [0], [0]>} : vector<2x8x8xbf16>, vector<2x8x32xbf16>, vector<2x8x32xf32> -> vector<2x8x32xf32>
    "tpu.trace_stop"() : () -> ()
    %59 = vector.shape_cast %58 : vector<2x8x32xf32> to vector<16x32xf32>
    %60 = arith.truncf %59 : vector<16x32xf32> to vector<16x32xbf16>
    %c0_22 = arith.constant 0 : index
    %c32 = arith.constant 32 : index
    %c0_23 = arith.constant 0 : index
    %61 = vector.load %arg5[%c0_22, %c32, %c0_23] : memref<1x128x128xbf16, #tpu.memory_space<vmem>>, vector<1x32x128xbf16>
    %62 = vector.shape_cast %61 : vector<1x32x128xbf16> to vector<32x128xbf16>
    %cst_24 = arith.constant dense<0.000000e+00> : vector<16x128xf32>
    %63 = tpu.matmul %60, %62, %cst_24 {dimension_numbers = #tpu.dot_dimension_numbers<[1], [0], [0], [1], [0, 0, 1, 1], [], []>} : vector<16x32xbf16>, vector<32x128xbf16>, vector<16x128xf32> -> vector<16x128xf32>
    %64 = arith.addf %39, %63 : vector<16x128xf32>
    %65 = vector.extract_strided_slice %13 {offsets = [0, 0, 64], sizes = [2, 8, 32], strides = [1, 1, 1]} : vector<2x8x384xf32> to vector<2x8x32xf32>
    %66 = arith.truncf %65 : vector<2x8x32xf32> to vector<2x8x32xbf16>
    %67 = vector.extract_strided_slice %13 {offsets = [0, 0, 192], sizes = [2, 8, 32], strides = [1, 1, 1]} : vector<2x8x384xf32> to vector<2x8x32xf32>
    %68 = arith.truncf %67 : vector<2x8x32xf32> to vector<2x8x32xbf16>
    %69 = vector.extract_strided_slice %13 {offsets = [0, 0, 320], sizes = [2, 8, 32], strides = [1, 1, 1]} : vector<2x8x384xf32> to vector<2x8x32xf32>
    %70 = arith.truncf %69 : vector<2x8x32xf32> to vector<2x8x32xbf16>
    "tpu.trace_start"() <{level = 10 : i32, message = "bqd,bkd->bqk"}> : () -> ()
    %cst_25 = arith.constant dense<0.000000e+00> : vector<2x8x8xf32>
    %71 = tpu.matmul %66, %68, %cst_25 {dimension_numbers = #tpu.dot_dimension_numbers<[2], [2], [1], [1], [0, 0, 0, 1, 1, 1], [0], [0]>} : vector<2x8x32xbf16>, vector<2x8x32xbf16>, vector<2x8x8xf32> -> vector<2x8x8xf32>
    "tpu.trace_stop"() : () -> ()
    %cst_26 = arith.constant dense<0xFF800000> : vector<2x8xf32>
    %72 = vector.multi_reduction <maximumf>, %71, %cst_26 [2] : vector<2x8x8xf32> to vector<2x8xf32>
    %73 = vector.shape_cast %72 : vector<2x8xf32> to vector<2x8x1xf32>
    %74 = vector.broadcast %73 : vector<2x8x1xf32> to vector<2x8x8xf32>
    %75 = arith.subf %71, %74 : vector<2x8x8xf32>
    %76 = math.exp %75 : vector<2x8x8xf32>
    %cst_27 = arith.constant dense<0.000000e+00> : vector<2x8xf32>
    %77 = vector.multi_reduction <add>, %76, %cst_27 [2] : vector<2x8x8xf32> to vector<2x8xf32>
    %78 = vector.shape_cast %77 : vector<2x8xf32> to vector<2x8x1xf32>
    %79 = tpu.reciprocal %78 {approx = true} : vector<2x8x1xf32> -> vector<2x8x1xf32>
    %80 = vector.broadcast %79 : vector<2x8x1xf32> to vector<2x8x8xf32>
    %81 = arith.mulf %76, %80 : vector<2x8x8xf32>
    %82 = arith.truncf %81 : vector<2x8x8xf32> to vector<2x8x8xbf16>
    "tpu.trace_start"() <{level = 10 : i32, message = "bqk,bkd->bqd"}> : () -> ()
    %cst_28 = arith.constant dense<0.000000e+00> : vector<2x8x32xf32>
    %83 = tpu.matmul %82, %70, %cst_28 {dimension_numbers = #tpu.dot_dimension_numbers<[2], [1], [1], [2], [0, 0, 0, 1, 1, 2], [0], [0]>} : vector<2x8x8xbf16>, vector<2x8x32xbf16>, vector<2x8x32xf32> -> vector<2x8x32xf32>
    "tpu.trace_stop"() : () -> ()
    %84 = vector.shape_cast %83 : vector<2x8x32xf32> to vector<16x32xf32>
    %85 = arith.truncf %84 : vector<16x32xf32> to vector<16x32xbf16>
    %c0_29 = arith.constant 0 : index
    %c64 = arith.constant 64 : index
    %c0_30 = arith.constant 0 : index
    %86 = vector.load %arg5[%c0_29, %c64, %c0_30] : memref<1x128x128xbf16, #tpu.memory_space<vmem>>, vector<1x32x128xbf16>
    %87 = vector.shape_cast %86 : vector<1x32x128xbf16> to vector<32x128xbf16>
    %cst_31 = arith.constant dense<0.000000e+00> : vector<16x128xf32>
    %88 = tpu.matmul %85, %87, %cst_31 {dimension_numbers = #tpu.dot_dimension_numbers<[1], [0], [0], [1], [0, 0, 1, 1], [], []>} : vector<16x32xbf16>, vector<32x128xbf16>, vector<16x128xf32> -> vector<16x128xf32>
    %89 = arith.addf %64, %88 : vector<16x128xf32>
    %90 = vector.extract_strided_slice %13 {offsets = [0, 0, 96], sizes = [2, 8, 32], strides = [1, 1, 1]} : vector<2x8x384xf32> to vector<2x8x32xf32>
    %91 = arith.truncf %90 : vector<2x8x32xf32> to vector<2x8x32xbf16>
    %92 = vector.extract_strided_slice %13 {offsets = [0, 0, 224], sizes = [2, 8, 32], strides = [1, 1, 1]} : vector<2x8x384xf32> to vector<2x8x32xf32>
    %93 = arith.truncf %92 : vector<2x8x32xf32> to vector<2x8x32xbf16>
    %94 = vector.extract_strided_slice %13 {offsets = [0, 0, 352], sizes = [2, 8, 32], strides = [1, 1, 1]} : vector<2x8x384xf32> to vector<2x8x32xf32>
    %95 = arith.truncf %94 : vector<2x8x32xf32> to vector<2x8x32xbf16>
    "tpu.trace_start"() <{level = 10 : i32, message = "bqd,bkd->bqk"}> : () -> ()
    %cst_32 = arith.constant dense<0.000000e+00> : vector<2x8x8xf32>
    %96 = tpu.matmul %91, %93, %cst_32 {dimension_numbers = #tpu.dot_dimension_numbers<[2], [2], [1], [1], [0, 0, 0, 1, 1, 1], [0], [0]>} : vector<2x8x32xbf16>, vector<2x8x32xbf16>, vector<2x8x8xf32> -> vector<2x8x8xf32>
    "tpu.trace_stop"() : () -> ()
    %cst_33 = arith.constant dense<0xFF800000> : vector<2x8xf32>
    %97 = vector.multi_reduction <maximumf>, %96, %cst_33 [2] : vector<2x8x8xf32> to vector<2x8xf32>
    %98 = vector.shape_cast %97 : vector<2x8xf32> to vector<2x8x1xf32>
    %99 = vector.broadcast %98 : vector<2x8x1xf32> to vector<2x8x8xf32>
    %100 = arith.subf %96, %99 : vector<2x8x8xf32>
    %101 = math.exp %100 : vector<2x8x8xf32>
    %cst_34 = arith.constant dense<0.000000e+00> : vector<2x8xf32>
    %102 = vector.multi_reduction <add>, %101, %cst_34 [2] : vector<2x8x8xf32> to vector<2x8xf32>
    %103 = vector.shape_cast %102 : vector<2x8xf32> to vector<2x8x1xf32>
    %104 = tpu.reciprocal %103 {approx = true} : vector<2x8x1xf32> -> vector<2x8x1xf32>
    %105 = vector.broadcast %104 : vector<2x8x1xf32> to vector<2x8x8xf32>
    %106 = arith.mulf %101, %105 : vector<2x8x8xf32>
    %107 = arith.truncf %106 : vector<2x8x8xf32> to vector<2x8x8xbf16>
    "tpu.trace_start"() <{level = 10 : i32, message = "bqk,bkd->bqd"}> : () -> ()
    %cst_35 = arith.constant dense<0.000000e+00> : vector<2x8x32xf32>
    %108 = tpu.matmul %107, %95, %cst_35 {dimension_numbers = #tpu.dot_dimension_numbers<[2], [1], [1], [2], [0, 0, 0, 1, 1, 2], [0], [0]>} : vector<2x8x8xbf16>, vector<2x8x32xbf16>, vector<2x8x32xf32> -> vector<2x8x32xf32>
    "tpu.trace_stop"() : () -> ()
    %109 = vector.shape_cast %108 : vector<2x8x32xf32> to vector<16x32xf32>
    %110 = arith.truncf %109 : vector<16x32xf32> to vector<16x32xbf16>
    %c0_36 = arith.constant 0 : index
    %c96 = arith.constant 96 : index
    %c0_37 = arith.constant 0 : index
    %111 = vector.load %arg5[%c0_36, %c96, %c0_37] : memref<1x128x128xbf16, #tpu.memory_space<vmem>>, vector<1x32x128xbf16>
    %112 = vector.shape_cast %111 : vector<1x32x128xbf16> to vector<32x128xbf16>
    %cst_38 = arith.constant dense<0.000000e+00> : vector<16x128xf32>
    %113 = tpu.matmul %110, %112, %cst_38 {dimension_numbers = #tpu.dot_dimension_numbers<[1], [0], [0], [1], [0, 0, 1, 1], [], []>} : vector<16x32xbf16>, vector<32x128xbf16>, vector<16x128xf32> -> vector<16x128xf32>
    %114 = arith.addf %89, %113 : vector<16x128xf32>
    %115 = arith.addf %4, %114 : vector<16x128xf32>
    %c0_39 = arith.constant 0 : index
    %c0_40 = arith.constant 0 : index
    %c0_41 = arith.constant 0 : index
    %116 = vector.load %arg6[%c0_39, %c0_40, %c0_41] : memref<1x1x128xf32, #tpu.memory_space<vmem>>, vector<1x1x128xf32>
    %117 = vector.shape_cast %116 : vector<1x1x128xf32> to vector<1x128xf32>
    %118 = vector.broadcast %117 : vector<1x128xf32> to vector<16x128xf32>
    %119 = arith.addf %115, %118 : vector<16x128xf32>
    %c0_42 = arith.constant 0 : index
    %c0_43 = arith.constant 0 : index
    %c0_44 = arith.constant 0 : index
    %120 = vector.load %arg7[%c0_42, %c0_43, %c0_44] : memref<1x1x128xf32, #tpu.memory_space<vmem>>, vector<1x1x128xf32>
    %121 = vector.shape_cast %120 : vector<1x1x128xf32> to vector<1x128xf32>
    %c0_45 = arith.constant 0 : index
    %c0_46 = arith.constant 0 : index
    %c0_47 = arith.constant 0 : index
    %122 = vector.load %arg8[%c0_45, %c0_46, %c0_47] : memref<1x1x128xf32, #tpu.memory_space<vmem>>, vector<1x1x128xf32>
    %123 = vector.shape_cast %122 : vector<1x1x128xf32> to vector<1x128xf32>
    %cst_48 = arith.constant dense<0.000000e+00> : vector<16xf32>
    %124 = vector.multi_reduction <add>, %119, %cst_48 [1] : vector<16x128xf32> to vector<16xf32>
    %125 = vector.shape_cast %124 : vector<16xf32> to vector<16x1xf32>
    %cst_49 = arith.constant 1.280000e+02 : f32
    %126 = vector.broadcast %cst_49 : f32 to vector<16x1xf32>
    %127 = arith.divf %125, %126 : vector<16x1xf32>
    %128 = vector.broadcast %127 : vector<16x1xf32> to vector<16x128xf32>
    %129 = arith.subf %119, %128 : vector<16x128xf32>
    %130 = arith.mulf %129, %129 : vector<16x128xf32>
    %cst_50 = arith.constant dense<0.000000e+00> : vector<16xf32>
    %131 = vector.multi_reduction <add>, %130, %cst_50 [1] : vector<16x128xf32> to vector<16xf32>
    %132 = vector.shape_cast %131 : vector<16xf32> to vector<16x1xf32>
    %cst_51 = arith.constant 1.280000e+02 : f32
    %133 = vector.broadcast %cst_51 : f32 to vector<16x1xf32>
    %134 = arith.divf %132, %133 : vector<16x1xf32>
    %135 = vector.broadcast %127 : vector<16x1xf32> to vector<16x128xf32>
    %136 = arith.subf %119, %135 : vector<16x128xf32>
    %cst_52 = arith.constant 9.99999974E-6 : f32
    %137 = vector.broadcast %cst_52 : f32 to vector<16x1xf32>
    %138 = arith.addf %134, %137 : vector<16x1xf32>
    %139 = math.rsqrt %138 : vector<16x1xf32>
    %140 = vector.broadcast %139 : vector<16x1xf32> to vector<16x128xf32>
    %141 = arith.mulf %136, %140 : vector<16x128xf32>
    %142 = vector.broadcast %121 : vector<1x128xf32> to vector<16x128xf32>
    %143 = arith.mulf %141, %142 : vector<16x128xf32>
    %144 = vector.broadcast %123 : vector<1x128xf32> to vector<16x128xf32>
    %145 = arith.addf %143, %144 : vector<16x128xf32>
    %146 = arith.truncf %145 : vector<16x128xf32> to vector<16x128xbf16>
    %c0_53 = arith.constant 0 : index
    %c0_54 = arith.constant 0 : index
    %c0_55 = arith.constant 0 : index
    %147 = vector.load %arg9[%c0_53, %c0_54, %c0_55] : memref<1x128x512xbf16, #tpu.memory_space<vmem>>, vector<1x128x512xbf16>
    %148 = vector.shape_cast %147 : vector<1x128x512xbf16> to vector<128x512xbf16>
    %cst_56 = arith.constant dense<0.000000e+00> : vector<16x512xf32>
    %149 = tpu.matmul %146, %148, %cst_56 {dimension_numbers = #tpu.dot_dimension_numbers<[1], [0], [0], [1], [0, 0, 1, 1], [], []>} : vector<16x128xbf16>, vector<128x512xbf16>, vector<16x512xf32> -> vector<16x512xf32>
    %c0_57 = arith.constant 0 : index
    %c0_58 = arith.constant 0 : index
    %c0_59 = arith.constant 0 : index
    %150 = vector.load %arg10[%c0_57, %c0_58, %c0_59] : memref<1x1x512xf32, #tpu.memory_space<vmem>>, vector<1x1x512xf32>
    %151 = vector.shape_cast %150 : vector<1x1x512xf32> to vector<1x512xf32>
    %152 = vector.broadcast %151 : vector<1x512xf32> to vector<16x512xf32>
    %153 = arith.addf %149, %152 : vector<16x512xf32>
    %cst_60 = arith.constant 5.000000e-01 : f32
    %154 = vector.broadcast %cst_60 : f32 to vector<16x512xf32>
    %155 = arith.mulf %154, %153 : vector<16x512xf32>
    %cst_61 = arith.constant 0.707106769 : f32
    %156 = vector.broadcast %cst_61 : f32 to vector<16x512xf32>
    %157 = arith.mulf %153, %156 : vector<16x512xf32>
    %cst_62 = arith.constant 0.000000e+00 : f32
    %158 = vector.broadcast %cst_62 : f32 to vector<16x512xf32>
    %159 = arith.cmpf oge, %157, %158 : vector<16x512xf32>
    %cst_63 = arith.constant 1.000000e+00 : f32
    %cst_64 = arith.constant -1.000000e+00 : f32
    %160 = vector.broadcast %cst_63 : f32 to vector<16x512xf32>
    %161 = vector.broadcast %cst_64 : f32 to vector<16x512xf32>
    %162 = arith.select %159, %160, %161 : vector<16x512xi1>, vector<16x512xf32>
    %163 = math.absf %157 : vector<16x512xf32>
    %cst_65 = arith.constant 0.327591091 : f32
    %164 = vector.broadcast %cst_65 : f32 to vector<16x512xf32>
    %165 = arith.mulf %164, %163 : vector<16x512xf32>
    %cst_66 = arith.constant 1.000000e+00 : f32
    %166 = vector.broadcast %cst_66 : f32 to vector<16x512xf32>
    %167 = arith.addf %166, %165 : vector<16x512xf32>
    %168 = tpu.reciprocal %167 {approx = true} : vector<16x512xf32> -> vector<16x512xf32>
    %cst_67 = arith.constant 1.06140542 : f32
    %169 = vector.broadcast %cst_67 : f32 to vector<16x512xf32>
    %170 = arith.mulf %169, %168 : vector<16x512xf32>
    %cst_68 = arith.constant -1.45315206 : f32
    %171 = vector.broadcast %cst_68 : f32 to vector<16x512xf32>
    %172 = arith.addf %170, %171 : vector<16x512xf32>
    %173 = arith.mulf %172, %168 : vector<16x512xf32>
    %cst_69 = arith.constant 1.42141378 : f32
    %174 = vector.broadcast %cst_69 : f32 to vector<16x512xf32>
    %175 = arith.addf %173, %174 : vector<16x512xf32>
    %176 = arith.mulf %175, %168 : vector<16x512xf32>
    %cst_70 = arith.constant -0.284496725 : f32
    %177 = vector.broadcast %cst_70 : f32 to vector<16x512xf32>
    %178 = arith.addf %176, %177 : vector<16x512xf32>
    %179 = arith.mulf %178, %168 : vector<16x512xf32>
    %cst_71 = arith.constant 0.254829586 : f32
    %180 = vector.broadcast %cst_71 : f32 to vector<16x512xf32>
    %181 = arith.addf %179, %180 : vector<16x512xf32>
    %182 = arith.mulf %181, %168 : vector<16x512xf32>
    %cst_72 = arith.constant 0.000000e+00 : f32
    %183 = vector.broadcast %cst_72 : f32 to vector<16x512xf32>
    %184 = arith.subf %183, %163 : vector<16x512xf32>
    %185 = arith.mulf %184, %163 : vector<16x512xf32>
    %186 = math.exp %185 : vector<16x512xf32>
    %187 = arith.mulf %182, %186 : vector<16x512xf32>
    %cst_73 = arith.constant 1.000000e+00 : f32
    %188 = vector.broadcast %cst_73 : f32 to vector<16x512xf32>
    %189 = arith.subf %188, %187 : vector<16x512xf32>
    %190 = arith.mulf %162, %189 : vector<16x512xf32>
    %cst_74 = arith.constant 1.000000e+00 : f32
    %191 = vector.broadcast %cst_74 : f32 to vector<16x512xf32>
    %192 = arith.addf %191, %190 : vector<16x512xf32>
    %193 = arith.mulf %155, %192 : vector<16x512xf32>
    %194 = arith.truncf %193 : vector<16x512xf32> to vector<16x512xbf16>
    %c0_75 = arith.constant 0 : index
    %c0_76 = arith.constant 0 : index
    %c0_77 = arith.constant 0 : index
    %195 = vector.load %arg11[%c0_75, %c0_76, %c0_77] : memref<1x512x128xbf16, #tpu.memory_space<vmem>>, vector<1x512x128xbf16>
    %196 = vector.shape_cast %195 : vector<1x512x128xbf16> to vector<512x128xbf16>
    %cst_78 = arith.constant dense<0.000000e+00> : vector<16x128xf32>
    %197 = tpu.matmul %194, %196, %cst_78 {dimension_numbers = #tpu.dot_dimension_numbers<[1], [0], [0], [1], [0, 0, 1, 1], [], []>} : vector<16x512xbf16>, vector<512x128xbf16>, vector<16x128xf32> -> vector<16x128xf32>
    %c0_79 = arith.constant 0 : index
    %c0_80 = arith.constant 0 : index
    %c0_81 = arith.constant 0 : index
    %198 = vector.load %arg12[%c0_79, %c0_80, %c0_81] : memref<1x1x128xf32, #tpu.memory_space<vmem>>, vector<1x1x128xf32>
    %199 = vector.shape_cast %198 : vector<1x1x128xf32> to vector<1x128xf32>
    %200 = vector.broadcast %199 : vector<1x128xf32> to vector<16x128xf32>
    %201 = arith.addf %197, %200 : vector<16x128xf32>
    %202 = arith.addf %119, %201 : vector<16x128xf32>
    %203 = vector.shape_cast %202 : vector<16x128xf32> to vector<2x8x128xf32>
    %c0_82 = arith.constant 0 : index
    %c0_83 = arith.constant 0 : index
    %c0_84 = arith.constant 0 : index
    %204 = vector.load %arg13[%c0_82, %c0_83, %c0_84] : memref<2x8x128xf32, #tpu.memory_space<vmem>>, vector<2x8x128xf32>
    tpu.vector_store %arg13[%c0_82, %c0_83, %c0_84], %203 {strides = array<i32>} : memref<2x8x128xf32, #tpu.memory_space<vmem>>, vector<2x8x128xf32>,
    return
  }
  func.func @transform_0(%arg0: i32, %arg1: i32) -> (i32, i32, i32) {
    %c0_i32 = arith.constant 0 : i32
    %c0_i32_0 = arith.constant 0 : i32
    %c0_i32_1 = arith.constant 0 : i32
    return %arg0, %c0_i32, %c0_i32_0 : i32, i32, i32
  }
  func.func @transform_1(%arg0: i32, %arg1: i32) -> (i32, i32, i32) {
    %c0_i32 = arith.constant 0 : i32
    %c0_i32_0 = arith.constant 0 : i32
    %c0_i32_1 = arith.constant 0 : i32
    return %arg1, %c0_i32, %c0_i32_0 : i32, i32, i32
  }
  func.func @transform_2(%arg0: i32, %arg1: i32) -> (i32, i32, i32) {
    %c0_i32 = arith.constant 0 : i32
    %c0_i32_0 = arith.constant 0 : i32
    %c0_i32_1 = arith.constant 0 : i32
    return %arg1, %c0_i32, %c0_i32_0 : i32, i32, i32
  }
  func.func @transform_3(%arg0: i32, %arg1: i32) -> (i32, i32, i32) {
    %c0_i32 = arith.constant 0 : i32
    %c0_i32_0 = arith.constant 0 : i32
    %c0_i32_1 = arith.constant 0 : i32
    return %arg1, %c0_i32, %c0_i32_0 : i32, i32, i32
  }
  func.func @transform_4(%arg0: i32, %arg1: i32) -> (i32, i32, i32) {
    %c0_i32 = arith.constant 0 : i32
    %c0_i32_0 = arith.constant 0 : i32
    %c0_i32_1 = arith.constant 0 : i32
    return %arg1, %c0_i32, %c0_i32_0 : i32, i32, i32
  }
  func.func @transform_5(%arg0: i32, %arg1: i32) -> (i32, i32, i32) {
    %c0_i32 = arith.constant 0 : i32
    %c0_i32_0 = arith.constant 0 : i32
    %c0_i32_1 = arith.constant 0 : i32
    return %arg1, %c0_i32, %c0_i32_0 : i32, i32, i32
  }
  func.func @transform_6(%arg0: i32, %arg1: i32) -> (i32, i32, i32) {
    %c0_i32 = arith.constant 0 : i32
    %c0_i32_0 = arith.constant 0 : i32
    %c0_i32_1 = arith.constant 0 : i32
    return %arg1, %c0_i32, %c0_i32_0 : i32, i32, i32
  }
  func.func @transform_7(%arg0: i32, %arg1: i32) -> (i32, i32, i32) {
    %c0_i32 = arith.constant 0 : i32
    %c0_i32_0 = arith.constant 0 : i32
    %c0_i32_1 = arith.constant 0 : i32
    return %arg1, %c0_i32, %c0_i32_0 : i32, i32, i32
  }
  func.func @transform_8(%arg0: i32, %arg1: i32) -> (i32, i32, i32) {
    %c0_i32 = arith.constant 0 : i32
    %c0_i32_0 = arith.constant 0 : i32
    %c0_i32_1 = arith.constant 0 : i32
    return %arg1, %c0_i32, %c0_i32_0 : i32, i32, i32
  }
  func.func @transform_9(%arg0: i32, %arg1: i32) -> (i32, i32, i32) {
    %c0_i32 = arith.constant 0 : i32
    %c0_i32_0 = arith.constant 0 : i32
    %c0_i32_1 = arith.constant 0 : i32
    return %arg1, %c0_i32, %c0_i32_0 : i32, i32, i32
  }
  func.func @transform_10(%arg0: i32, %arg1: i32) -> (i32, i32, i32) {
    %c0_i32 = arith.constant 0 : i32
    %c0_i32_0 = arith.constant 0 : i32
    %c0_i32_1 = arith.constant 0 : i32
    return %arg1, %c0_i32, %c0_i32_0 : i32, i32, i32
  }
  func.func @transform_11(%arg0: i32, %arg1: i32) -> (i32, i32, i32) {
    %c0_i32 = arith.constant 0 : i32
    %c0_i32_0 = arith.constant 0 : i32
    %c0_i32_1 = arith.constant 0 : i32
    return %arg0, %c0_i32, %c0_i32_0 : i32, i32, i32
  }
}

module attributes {stable_mosaic.version = 11 : i64} {
  func.func @_lnf_head_kernel(%arg0: i32, %arg1: memref<16x128xf32, #tpu.memory_space<vmem>>, %arg2: memref<1x128xf32, #tpu.memory_space<vmem>>, %arg3: memref<1x128xf32, #tpu.memory_space<vmem>>, %arg4: memref<128x128xbf16, #tpu.memory_space<vmem>>, %arg5: memref<16x128xf32, #tpu.memory_space<vmem>>) attributes {dimension_semantics = [#tpu.dimension_semantics<parallel>], iteration_bounds = array<i64: 1>, scalar_prefetch = 0 : i64, scratch_operands = 0 : i64, tpu.core_type = #tpu.core_type<tc>, window_params = [{pipeline_mode = #tpu.pipeline_mode<synchronous>, transform_indices = @transform_0, window_bounds = array<i64: 16, 128>}, {pipeline_mode = #tpu.pipeline_mode<synchronous>, transform_indices = @transform_1, window_bounds = array<i64: 1, 128>}, {pipeline_mode = #tpu.pipeline_mode<synchronous>, transform_indices = @transform_2, window_bounds = array<i64: 1, 128>}, {transform_indices = @transform_3, window_bounds = array<i64: 128, 128>}, {transform_indices = @transform_4, window_bounds = array<i64: 16, 128>}]} {
    %c0 = arith.constant 0 : index
    %c0_0 = arith.constant 0 : index
    %0 = vector.load %arg1[%c0, %c0_0] : memref<16x128xf32, #tpu.memory_space<vmem>>, vector<16x128xf32>
    %c0_1 = arith.constant 0 : index
    %c0_2 = arith.constant 0 : index
    %1 = vector.load %arg2[%c0_1, %c0_2] : memref<1x128xf32, #tpu.memory_space<vmem>>, vector<1x128xf32>
    %c0_3 = arith.constant 0 : index
    %c0_4 = arith.constant 0 : index
    %2 = vector.load %arg3[%c0_3, %c0_4] : memref<1x128xf32, #tpu.memory_space<vmem>>, vector<1x128xf32>
    %cst = arith.constant dense<0.000000e+00> : vector<16xf32>
    %3 = vector.multi_reduction <add>, %0, %cst [1] : vector<16x128xf32> to vector<16xf32>
    %4 = vector.shape_cast %3 : vector<16xf32> to vector<16x1xf32>
    %cst_5 = arith.constant 1.280000e+02 : f32
    %5 = vector.broadcast %cst_5 : f32 to vector<16x1xf32>
    %6 = arith.divf %4, %5 : vector<16x1xf32>
    %7 = vector.broadcast %6 : vector<16x1xf32> to vector<16x128xf32>
    %8 = arith.subf %0, %7 : vector<16x128xf32>
    %9 = arith.mulf %8, %8 : vector<16x128xf32>
    %cst_6 = arith.constant dense<0.000000e+00> : vector<16xf32>
    %10 = vector.multi_reduction <add>, %9, %cst_6 [1] : vector<16x128xf32> to vector<16xf32>
    %11 = vector.shape_cast %10 : vector<16xf32> to vector<16x1xf32>
    %cst_7 = arith.constant 1.280000e+02 : f32
    %12 = vector.broadcast %cst_7 : f32 to vector<16x1xf32>
    %13 = arith.divf %11, %12 : vector<16x1xf32>
    %14 = vector.broadcast %6 : vector<16x1xf32> to vector<16x128xf32>
    %15 = arith.subf %0, %14 : vector<16x128xf32>
    %cst_8 = arith.constant 9.99999974E-6 : f32
    %16 = vector.broadcast %cst_8 : f32 to vector<16x1xf32>
    %17 = arith.addf %13, %16 : vector<16x1xf32>
    %18 = math.rsqrt %17 : vector<16x1xf32>
    %19 = vector.broadcast %18 : vector<16x1xf32> to vector<16x128xf32>
    %20 = arith.mulf %15, %19 : vector<16x128xf32>
    %21 = vector.broadcast %1 : vector<1x128xf32> to vector<16x128xf32>
    %22 = arith.mulf %20, %21 : vector<16x128xf32>
    %23 = vector.broadcast %2 : vector<1x128xf32> to vector<16x128xf32>
    %24 = arith.addf %22, %23 : vector<16x128xf32>
    %25 = arith.truncf %24 : vector<16x128xf32> to vector<16x128xbf16>
    %c0_9 = arith.constant 0 : index
    %c0_10 = arith.constant 0 : index
    %26 = vector.load %arg4[%c0_9, %c0_10] : memref<128x128xbf16, #tpu.memory_space<vmem>>, vector<128x128xbf16>
    %cst_11 = arith.constant dense<0.000000e+00> : vector<16x128xf32>
    %27 = tpu.matmul %25, %26, %cst_11 {dimension_numbers = #tpu.dot_dimension_numbers<[1], [0], [0], [1], [0, 0, 1, 1], [], []>} : vector<16x128xbf16>, vector<128x128xbf16>, vector<16x128xf32> -> vector<16x128xf32>
    %c0_12 = arith.constant 0 : index
    %c0_13 = arith.constant 0 : index
    %28 = vector.load %arg5[%c0_12, %c0_13] : memref<16x128xf32, #tpu.memory_space<vmem>>, vector<16x128xf32>
    tpu.vector_store %arg5[%c0_12, %c0_13], %27 {strides = array<i32>} : memref<16x128xf32, #tpu.memory_space<vmem>>, vector<16x128xf32>,
    return
  }
  func.func @transform_0(%arg0: i32) -> (i32, i32) {
    %c0_i32 = arith.constant 0 : i32
    %c0_i32_0 = arith.constant 0 : i32
    %c0_i32_1 = arith.constant 0 : i32
    return %c0_i32, %c0_i32_0 : i32, i32
  }
  func.func @transform_1(%arg0: i32) -> (i32, i32) {
    %c0_i32 = arith.constant 0 : i32
    %c0_i32_0 = arith.constant 0 : i32
    %c0_i32_1 = arith.constant 0 : i32
    return %c0_i32, %c0_i32_0 : i32, i32
  }
  func.func @transform_2(%arg0: i32) -> (i32, i32) {
    %c0_i32 = arith.constant 0 : i32
    %c0_i32_0 = arith.constant 0 : i32
    %c0_i32_1 = arith.constant 0 : i32
    return %c0_i32, %c0_i32_0 : i32, i32
  }
  func.func @transform_3(%arg0: i32) -> (i32, i32) {
    %c0_i32 = arith.constant 0 : i32
    %c0_i32_0 = arith.constant 0 : i32
    return %c0_i32, %arg0 : i32, i32
  }
  func.func @transform_4(%arg0: i32) -> (i32, i32) {
    %c0_i32 = arith.constant 0 : i32
    %c0_i32_0 = arith.constant 0 : i32
    return %c0_i32, %arg0 : i32, i32
  }
}

</mosaic_0001>

<bundles_post_ra>
// kernel: tiny_transformer_forward.3
= control target key start
LH: loop header
LB: loop body
LE: loop exit
PB: predicated region body
PF: predicated region fallthrough
CT: control target
= control target key end

     0   :  { %v226_v2 = vmov 0.0   ;;  %vm227_vm0 = vmmov 0   ;;  %s295_s0 = inlined_call_operand.vmem [shape: f32[16,128], index: 0, kind: input, shape index: {}]   ;;  %s296_s3 = inlined_call_operand.vmem [shape: bf16[128,128], index: 3, kind: input, shape index: {}]   ;;  %s297_s1 = inlined_call_operand.vmem [shape: f32[1,128], index: 1, kind: input, shape index: {}]   ;;  %s298_s2 = inlined_call_operand.vmem [shape: f32[1,128], index: 2, kind: input, shape index: {}]   ;;  %s299_s4 = inlined_call_operand.vmem [shape: f32[16,128], index: 4, kind: output, shape index: {}]  }
   0x1   :  { %v18_v0 = vld [vmem:[%s295_s0] sm:$0xff]  ;;  %v19_v1 = vld [vmem:[%s295_s0 + $0x8] sm:$0xff]  ;;  %192 = vmatprep.subr.bf16.mxu0 %v226_v2  ;;  %v214_v3 = vld [vmem:[%s296_s3 + $0x38] sm:$0xff]   ;;  %208 = vmatprep.mubr.msk.bf16.mxu0 %vm227_vm0, %v226_v2 }
   0x2   :  { %22 = vadd.xlane.f32.xlu0 %v18_v0  ;;  %193 = vmatpush3.bf16.msra.mxu0 %v214_v3  ;;  %v215_v12 = vld [vmem:[%s296_s3 + $0x30] sm:$0xff]   ;;  %v216_v13 = vld [vmem:[%s296_s3 + $0x28] sm:$0xff]   ;;  %v217_v14 = vld [vmem:[%s296_s3 + $0x20] sm:$0xff]  }
   0x3   :  { %194 = vmatprep.subr.bf16.mxu0 %v226_v2  ;;  %v218_v15 = vld [vmem:[%s296_s3 + $0x18] sm:$0xff]   ;;  %v219_v16 = vld [vmem:[%s296_s3 + $0x10] sm:$0xff]   ;;  %v220_v17 = vld [vmem:[%s296_s3 + $0x8] sm:$0xff]  }
   0x4   :  { %v221_v18 = vld [vmem:[%s296_s3] sm:$0xff]  }
   0x5   :  { %v173_v27 = vld [vmem:[%s297_s1] ss:$0 sm:$0xff] }
   0x6   :  { %24 = vadd.xlane.f32.xlu0 %v19_v1  ;;  %195 = vmatpush3.bf16.msra.mxu0 %v215_v12  ;;  %v174_v31 = vld [vmem:[%s298_s2] ss:$0 sm:$0xff] }
   0x7   :  { %196 = vmatprep.subr.bf16.mxu0 %v226_v2 }
   0xa   :  { %197 = vmatpush3.bf16.msra.mxu0 %v216_v13 }
   0xb   :  { %198 = vmatprep.subr.bf16.mxu0 %v226_v2 }
   0xe   :  { %199 = vmatpush3.bf16.msra.mxu0 %v217_v14 }
   0xf   :  { %200 = vmatprep.subr.bf16.mxu0 %v226_v2 }
  0x12   :  { %201 = vmatpush3.bf16.msra.mxu0 %v218_v15 }
  0x13   :  { %202 = vmatprep.subr.bf16.mxu0 %v226_v2 }
  0x16   :  { %203 = vmatpush3.bf16.msra.mxu0 %v219_v16 }
  0x17   :  { %204 = vmatprep.subr.bf16.mxu0 %v226_v2 }
  0x1a   :  { %205 = vmatpush3.bf16.msra.mxu0 %v220_v17 }
  0x1b   :  { %206 = vmatprep.subr.bf16.mxu0 %v226_v2 }
  0x1e   :  { %207 = vmatpush3.bf16.msra.mxu0 %v221_v18 }
  0x8b   :  { %v23_v4 = vpop.xlane.xlu0 %22 }
  0x8c   :  { %v27_v5 = vmul.f32 0.0078125, %v23_v4 }
  0x8e   :  { %v29_v6 = vsub.f32 %v18_v0, %v27_v5 }
  0x8f   :  { %v25_v7 = vpop.xlane.xlu0 %24 }
  0x90   :  { %v28_v8 = vmul.f32 0.0078125, %v25_v7  ;;  %v31_v9 = vmul.f32 %v29_v6, %v29_v6 }
  0x92   :  { %v30_v10 = vsub.f32 %v19_v1, %v28_v8  ;;  %33 = vadd.xlane.f32.xlu1 %v31_v9 }
  0x94   :  { %v32_v11 = vmul.f32 %v30_v10, %v30_v10 }
  0x96   :  { %35 = vadd.xlane.f32.xlu1 %v32_v11 }
 0x11b   :  { %v34_v19 = vpop.xlane.xlu1 %33 }
 0x11c   :  { %v37_v20 = vmul.f32 0.0078125, %v34_v19 }
 0x11e   :  { %v39_v21 = vadd.f32 1e-05, %v37_v20 }
 0x11f   :  { %v36_v22 = vpop.xlane.xlu1 %35 }
 0x120   :  { %222 = vrsqrt.f32 %v39_v21  ;;  %v38_v23 = vmul.f32 0.0078125, %v36_v22 }
 0x122   :  { %v40_v24 = vadd.f32 1e-05, %v38_v23 }
 0x124   :  { %224 = vrsqrt.f32 %v40_v24 }
 0x12d   :  { %v223_v25 = vpop.eup %222 }
 0x12e   :  { %v43_v26 = vmul.f32 %v223_v25, %v29_v6 }
 0x130   :  { %v51_v30 = vmul.f32 %v173_v27, %v43_v26 }
 0x131   :  { %v225_v28 = vpop.eup %224 }
 0x132   :  { %v44_v29 = vmul.f32 %v225_v28, %v30_v10  ;;  %v59_v33 = vadd.f32 %v174_v31, %v51_v30 }
 0x134   :  { %v52_v32 = vmul.f32 %v173_v27, %v44_v29 }
 0x136   :  { %v60_v34 = vadd.f32 %v174_v31, %v52_v32 }
 0x138   :  { %v61_v35 = vpack.c.bf16 %v60_v34, %v59_v33 }
 0x13a   :  { %209 = vmatmul.mubr.bf16.vlgmr.msra.gmra.mxu0 %v61_v35 }
 0x1fa   :  { %v160_v36 = vpop.f32.mrf.mxu0 }
 0x1fb   :  { %167 = vst [vmem:[%s299_s4] sm:$0xff] %v160_v36 }
 0x1fc   :  { %v210_v37 = vpop.f32.mrf.mxu0 }
 0x1fe   :  { %v163_v38 = vpop.f32.mrf.mxu0 }
 0x1ff   :  { %168 = vst [vmem:[%s299_s4 + $0x8] sm:$0xff] %v163_v38 }
 0x200   :  { %v211_v39 = vpop.f32.mrf.mxu0 }

// kernel: tiny_transformer_forward.2
= control target key start
LH: loop header
LB: loop body
LE: loop exit
PB: predicated region body
PF: predicated region fallthrough
CT: control target
= control target key end

     0   :  { %s4734_s0 = inlined_call_operand.vmem [shape: f32[2,8,128], index: 0, kind: input, shape index: {}, may-alias: {0,11}]   ;;  %s4735_s1 = inlined_call_operand.hbm [shape: bf16[2,128,384], index: 1, kind: input, shape index: {}]   ;;  %s4736_s2 = inlined_call_operand.vmem [shape: f32[2,1,384], index: 2, kind: input, shape index: {}]   ;;  %s4737_s3 = inlined_call_operand.hbm [shape: bf16[2,128,128], index: 3, kind: input, shape index: {}]   ;;  %s4738_s4 = inlined_call_operand.vmem [shape: f32[2,1,128], index: 4, kind: input, shape index: {}]   ;;  %s4739_s5 = inlined_call_operand.vmem [shape: f32[2,1,128], index: 5, kind: input, shape index: {}]   ;;  %s4740_s6 = inlined_call_operand.vmem [shape: f32[2,1,128], index: 6, kind: input, shape index: {}]   ;;  %s4741_s7 = inlined_call_operand.vmem [shape: bf16[2,128,512], index: 7, kind: input, shape index: {}]   ;;  %s4742_s8 = inlined_call_operand.vmem [shape: f32[2,1,512], index: 8, kind: input, shape index: {}]   ;;  %s4743_s9 = inlined_call_operand.hbm [shape: bf16[2,512,128], index: 9, kind: input, shape index: {}]   ;;  %s4744_s10 = inlined_call_operand.vmem [shape: f32[2,1,128], index: 10, kind: input, shape index: {}]   ;;  %s4745_s11 = inlined_call_operand.vmem [shape: f32[2,8,128], index: 11, kind: output, shape index: {}, may-alias: {0,11}]  }
   0x1   :  { %4754 = sst [smem:[#allocation12_spill]] %s4734_s0 }
   0x2   :  { %4755 = sst [smem:[#allocation13_spill]] %s4735_s1 }
   0x3   :  { %4756 = sst [smem:[#allocation14_spill]] %s4736_s2 }
   0x4   :  { %4757 = sst [smem:[#allocation15_spill]] %s4737_s3 }
   0x5   :  { %4758 = sst [smem:[#allocation16_spill]] %s4743_s9 }
   0x6   :  { %4759 = sst [smem:[#allocation17_spill]] %s4744_s10 }
   0x7   :  { %4760 = sst [smem:[#allocation18_spill]] %s4745_s11 }
   0x8   :  { %16 = vsyncpa [#allocation3], 0 }
   0x9   :  { %18 = vsyncpa [#allocation3 + $0x1], 0 }
   0xa   :  { %19 = vsyncpa [#allocation5], 0 }
   0xb   :  { %21 = vsyncpa [#allocation5 + $0x1], 0  ;;  %s4022_s17 = smov 0   ;;  %s4024_s18 = smov 0  }
   0xc   :  { %s4026_s19 = smov 0   ;;  %s4028_s20 = smov 0  }
   0xd   :  { %s4030_s21 = smov 0   ;;  %s4032_s22 = smov 0  }
   0xe LB: > { %4761 = sst [smem:[#allocation9_spill]] %s3934_s19  ;;  %s4746_s23 = sadd.s32 4294967295, %s3946_s22   ;;  %s3946_s22 = sphi %s4032_s22, %s27_s22   ;;  %s3942_s21 = sphi %s4030_s21, %s4789_s21   ;;  %s3938_s20 = sphi %s4028_s20, %s4788_s20   ;;  %s3934_s19 = sphi %s4026_s19, %s4784_s19   ;;  %s3930_s18 = sphi %s4024_s18, %s4787_s18   ;;  %s3926_s17 = sphi %s4022_s17, %s4786_s17  }
   0xf   : > { %s36_s24 = sadd.s32 1, %s3942_s21  ;;  %s72_s25 = sadd.s32 1, %s3934_s19 }
  0x10   : > { %p37_p0 = scmp.ge.s32.totalorder %s36_s24, 2  ;;  %p79_p1 = scmp.ne.s32.totalorder %s3934_s19, %s3930_s18 }
  0x11   : > { %p80_p2 = scmp.eq.s32.totalorder %s3946_s22, 0  ;;  %p85_p4 = scmp.ne.s32.totalorder %s3930_s18, %s3926_s17 }
  0x12   : > { %s4791_s24 = smov (%p37_p0, %s36_s24), 0  ;;  %p86_p5 = scmp.eq.s32.totalorder %s4746_s23, 0 }
  0x13   : > { %4762 = sst [smem:[#allocation10_spill]] %s4791_s24  ;;  %p81_p3 = por %p80_p2, %p79_p1 }
  0x14   : > { %s69_s26 = ssub.s32 %s3942_s21, %s4791_s24  ;;  %p4063_p7 = por %p86_p5, %p85_p4 }
  0x15   : > { %p70_p6 = scmp.eq.s32.totalorder %s69_s26, 0  ;;  %p3560_p8 = scmp.lt.s32.totalorder %s3946_s22, 2 }
  0x16   : > { %s4072_s29 = sand.u32 1, %s3934_s19   ;;  %s406_s12 = sand.u32 1, %s3946_s22  }
  0x17   : > { %s4069_s28 = scalar_select %p70_p6, %s3934_s19, %s72_s25  }
  0x18   : > { %p4074_p9 = pnand %p3560_p8, %p81_p3  ;;  %s3155_s13 = sshll.u32 %s4072_s29, 6 }
  0x19   : > { %4764 = sst [smem:[#allocation11_spill]] %s4069_s28  ;;  %s3292_s14 = sshll.u32 %s3942_s21, 10 }
  0x1a   : > { %s4766_s3 = sld [smem:[#allocation15_spill]]  ;;  %s410_s26 = scalar_lea.vmem [#allocation4], %s3155_s13 }
  0x1b   : > { %s417_s23 = sshll.u32 %s410_s26, 4  ;;  %p3161_p10 = scmp.ge.s32.totalorder %s3946_s22, 1  ;;  %s418_s23 = int_to_ptr.vmem [resolvable:$true] %s417_s23 }
  0x1c   : > { %s4085_s25 = scalar_lea.sflag [#allocation5], %s406_s12  ;;  %p3810_p11 = pneg %p4074_p9 }
  0x1d   : > { %s3821_s24 = scalar_lea.vmem %s418_s23, 1024  ;;  %s3948_s28 = smov [#allocation4]  }
  0x1e   : > { %p3822_p12 = scmp.ne.s32.totalorder %s418_s23, %s3821_s24  ;;  %s3826_s19 = sshll.u32 %s3948_s28, 4  ;;  %s3827_s19 = int_to_ptr.vmem [resolvable:$false] %s3826_s19 }
  0x1f   : > { %s3828_s11 = scalar_lea.vmem %s3827_s19, 2048  ;;  %p3829_p1 = scmp.lt.s32.totalorder %s418_s23, %s3827_s19 }
  0x20   : > { %s416_s17 = scalar_lea.hbm %s4766_s3, %s3292_s14  ;;  %p3824_p13 = pnand %p3822_p12, %p3810_p11 }
  0x21   : > { %p3830_p2 = scmp.lt.s32.totalorder %s3828_s11, %s3821_s24 }
  0x22   : > { %p3825_p0 = pneg %p3824_p13 }
  0x23   : > { %p3831_p3 = por %p3830_p2, %p3829_p1 }
  0x25   : > { %p3832_p4 = pnand %p3831_p3, %p3825_p0 }
  0x27   : > { %3835 = shalt.err (!%p3832_p4)
}
  0x28   : > { %s4752_s13 = smov 64   ;;  %s4753_s12 = smov 4  }
  0x29   : > { %3556 = dma.hbm_to_vmem [thread:$0]  (!%p4074_p9), %s416_s17, 1024, %s418_s23, %s4085_s25, %s4752_s13, %s4752_s13, %s4753_s12  }
  0x2a   : > { %p485_p5 = scmp.lt.s32.totalorder %s3946_s22, 3  ;;  %s3540_s19 = smul.u32 192, %s4072_s29 }
  0x2b   : > { %s3541_s24 = smul.u32 3072, %s3942_s21  ;;  %s4768_s1 = sld [smem:[#allocation13_spill]] }
  0x2c   : > { %p4101_p6 = pnand %p3161_p10, %p485_p5  ;;  %s382_s16 = scalar_lea.vmem [#allocation2], %s3540_s19 }
  0x2d   : > { %s389_s26 = sshll.u32 %s382_s16, 4  ;;  %s3158_s3 = sshll.u32 %s4072_s29, 8  ;;  %s390_s26 = int_to_ptr.vmem [resolvable:$true] %s389_s26 }
  0x2e   : > { %s379_s0 = scalar_lea.sflag [#allocation3], %s4072_s29  ;;  %s3849_s10 = scalar_lea.vmem %s390_s26, 3072 }
  0x2f   : > { %p3850_p8 = scmp.ne.s32.totalorder %s390_s26, %s3849_s10  ;;  %s3951_s23 = smov [#allocation2]  }
  0x30   : > { %s3854_s17 = sshll.u32 %s3951_s23, 4  ;;  %s3855_s17 = int_to_ptr.vmem [resolvable:$false] %s3854_s17 }
  0x31   : > { %s388_s15 = scalar_lea.hbm %s4768_s1, %s3541_s24  ;;  %p3852_p12 = pnand %p3850_p8, %p3810_p11 }
  0x32   : > { %s3856_s13 = scalar_lea.vmem %s3855_s17, 6144  ;;  %p3857_p13 = scmp.lt.s32.totalorder %s390_s26, %s3855_s17 }
  0x33   : > { %p3853_p10 = pneg %p3852_p12  ;;  %p3858_p0 = scmp.lt.s32.totalorder %s3856_s13, %s3849_s10 }
  0x35   : > { %p3859_p1 = por %p3858_p0, %p3857_p13 }
  0x37   : > { %p3860_p2 = pnand %p3859_p1, %p3853_p10 }
  0x39   : > { %3863 = shalt.err (!%p3860_p2)
}
  0x3a   : > { %s3952_s19 = smov 192   ;;  %s3953_s29 = smov 12  }
  0x3b   : > { %3553 = dma.hbm_to_vmem [thread:$0]  (!%p4074_p9), %s388_s15, 3072, %s390_s26, %s379_s0, %s3952_s19, %s3952_s19, %s3953_s29  }
  0x3c   : > { %s3293_s24 = sshll.u32 %s3942_s21, 12  ;;  %s4769_s9 = sld [smem:[#allocation16_spill]] }
  0x3d   : > { %s464_s23 = scalar_lea.vmem [#allocation6], %s3158_s3  ;;  %s3954_s10 = smov [#allocation6]  }
  0x3e   : > { %s471_s12 = sshll.u32 %s464_s23, 4  ;;  %s3882_s13 = sshll.u32 %s3954_s10, 4  ;;  %s472_s12 = int_to_ptr.vmem [resolvable:$true] %s471_s12  ;;  %s3883_s13 = int_to_ptr.vmem [resolvable:$false] %s3882_s13 }
  0x3f   : > { %s3877_s17 = scalar_lea.vmem %s472_s12, 4096  ;;  %s3884_s1 = scalar_lea.vmem %s3883_s13, 8192 }
  0x40   : > { %p3878_p3 = scmp.ne.s32.totalorder %s472_s12, %s3877_s17  ;;  %p3885_p8 = scmp.lt.s32.totalorder %s472_s12, %s3883_s13 }
  0x41   : > { %p3886_p12 = scmp.lt.s32.totalorder %s3884_s1, %s3877_s17 }
  0x42   : > { %s470_s16 = scalar_lea.hbm %s4769_s9, %s3293_s24  ;;  %p3880_p4 = pnand %p3878_p3, %p3810_p11 }
  0x43   : > { %p3887_p10 = por %p3886_p12, %p3885_p8 }
  0x44   : > { %p3881_p5 = pneg %p3880_p4 }
  0x46   : > { %p3888_p13 = pnand %p3887_p10, %p3881_p5 }
  0x48   : > { %3891 = shalt.err (!%p3888_p13)
}
  0x49   : > { %s4770_s0 = smov 4   ;;  %s4771_s3 = smov 64  }
  0x4a   : > { %3559 = dma.hbm_to_vmem [thread:$0]  (!%p4074_p9), %s470_s16, 4096, %s472_s12, %s4085_s25, %s4771_s3, %s4771_s3, %s4770_s0  }
  0x4b   : > { %489 = sbr.rel (%p4101_p6) target bundleno = 3962 (0xf7a), region = 64  ;;  %s491_s15 = sand.u32 (!%p4101_p6), 1, %s3930_s18  }
  0x4c   : > { %s3542_s26 = smul.u32 (!%p4101_p6), 192, %s491_s15  ;;  %s492_s19 = scalar_lea.sflag (!%p4101_p6), [#allocation3], %s491_s15 }
  0x4e   : > { %s4133_s29 = scalar_lea.vmem (!%p4101_p6), [#allocation2], %s3542_s26 }
  0x50   : > { %3917 = dma.done.wait (%p4063_p7), %s492_s19, 3072  }
  0x51   : > { %3919 = vsyncadd (%p4063_p7), %s492_s19, 4294964224  ;;  %s4772_s1 = sadd.s32 4294967295, %s3946_s22   ;;  %s3162_s25 = sshll.u32 %s491_s15, 6 }
  0x52   : > { %s500_s30 = sand.u32 1, %s4772_s1   ;;  %s4141_s11 = scalar_lea.vmem [#allocation4], %s3162_s25 }
  0x53   : > { %s501_s12 = scalar_lea.sflag [#allocation5], %s500_s30 }
  0x54   : > { %3921 = dma.done.wait (%p4063_p7), %s501_s12, 5120  }
  0x55   : > { %3923 = vsyncadd (%p4063_p7), %s501_s12, 4294962176  ;;  %s3163_s24 = sshll.u32 %s491_s15, 8  ;;  %p598_p9 = scmp.lt.s32.totalorder %s3938_s20, 1 }
  0x56   : > { %s4773_s2 = sld [smem:[#allocation14_spill]]  ;;  %s4185_s13 = scalar_lea.vmem [#allocation6], %s3163_s24 }
  0x57   : > { %s4149_s28 = scalar_select %p598_p9, %s3938_s20, 1 }
  0x58   : > { %s4774_s3 = sld [smem:[#allocation17_spill]]  ;;  %p3167_p7 = scmp.ne.s32.totalorder %s3938_s20, 0 }
  0x59   : > { %s3543_s14 = smul.u32 3, %s4149_s28  ;;  %s3294_s30 = sshll.u32 %s4149_s28, 8 }
  0x5a   : > { %s4173_s9 = scalar_lea.vmem %s4741_s7, %s3294_s30  ;;  %s3166_s16 = sshll.u32 %s4149_s28, 2 }
  0x5b   : > { %s4179_s27 = scalar_lea.vmem %s4742_s8, %s3166_s16  ;;  %633 = sbr.rel (%p3167_p7) target bundleno = 101 (0x65), region = 80 }
  0x5c   : > { %s4167_s1 = scalar_lea.vmem %s4773_s2, %s3543_s14  ;;  %s4775_s19 = sld [smem:[#allocation12_spill]] (!%p3167_p7) }
  0x5d   : > { %s4777_s23 = sld [smem:[#allocation18_spill]] (!%p3167_p7) }
  0x5e   : > { %s622_s15 = scalar_lea.vmem %s4774_s3, %s4149_s28 }
  0x62   : > { %s4776_s25 = smov %s4775_s19  ;;  %v634_v0 = vld [vmem:[%s4775_s19] sm:$0xff] }
  0x63   : > { %v635_v1 = vld [vmem:[%s4776_s25 + $0x8] sm:$0xff] }
  0x64   : > { %636 = vst [vmem:[%s4777_s23] sm:$0xff] %v634_v0  ;;  %637 = vst [vmem:[%s4777_s23 + $0x8] sm:$0xff] %v635_v1 }
  0x65 PF: > { %v3620_v2 = vld [vmem:[%s4133_s29 + $0xac] ss:$12 sps:$4 sm:$0xff]   ;;  %v3622_v3 = vld [vmem:[%s4133_s29 + $0xa8] ss:$12 sps:$4 sm:$0xff]   ;;  %v3955_v4 = vmov 0   ;;  %v3956_v5 = vmov 0.0   ;;  %v675_v31 = vlaneseq  ;;  %s4779_s19 = scalar_lea.vmem %s4738_s4, %s4149_s28  ;;  %s4780_s12 = scalar_lea.vmem %s4739_s5, %s4149_s28 }
  0x66   : > { %850 = vmatprep.mubr.bf16.mxu0 %v3955_v4  ;;  %3392 = vmatprep.subr.bf16.mxu1 %v3956_v5  ;;  %v3623_v6 = vld [vmem:[%s4133_s29 + $0x94] ss:$12 sps:$4 sm:$0xff]   ;;  %v3625_v7 = vld [vmem:[%s4133_s29 + $0x90] ss:$12 sps:$4 sm:$0xff]   ;;  %v3628_v9 = vld [vmem:[%s4133_s29 + $0x78] ss:$12 sps:$4 sm:$0xff]   ;;  %s4781_s23 = scalar_lea.vmem %s4740_s6, %s4149_s28 }
  0x67   : > { %818 = vmatprep.subr.bf16.mxu0 %v3620_v2  ;;  %v3626_v8 = vld [vmem:[%s4133_s29 + $0x7c] ss:$12 sps:$4 sm:$0xff]   ;;  %v3629_v10 = vld [vmem:[%s4133_s29 + $0x64] ss:$12 sps:$4 sm:$0xff]   ;;  %v3631_v11 = vld [vmem:[%s4133_s29 + $0x60] ss:$12 sps:$4 sm:$0xff]  }
  0x68   : > { %819 = vmatpush1.bf16.msra.mxu0 %v3622_v3  ;;  %v3632_v12 = vld [vmem:[%s4133_s29 + $0x4c] ss:$12 sps:$4 sm:$0xff]   ;;  %v3644_v13 = vld [vmem:[%s4133_s29 + $0xb0] ss:$12 sps:$4 sm:$0xff]   ;;  %v3634_v15 = vld [vmem:[%s4133_s29 + $0x48] ss:$12 sps:$4 sm:$0xff]  }
  0x69   : > { %820 = vmatprep.subr.bf16.mxu0 %v3623_v6  ;;  %3393 = vmatpush3.bf16.msra.mxu1 %v3644_v13  ;;  %v3645_v14 = vld [vmem:[%s4133_s29 + $0x98] ss:$12 sps:$4 sm:$0xff]   ;;  %v3635_v16 = vld [vmem:[%s4133_s29 + $0x34] ss:$12 sps:$4 sm:$0xff]   ;;  %v3637_v17 = vld [vmem:[%s4133_s29 + $0x30] ss:$12 sps:$4 sm:$0xff]  }
  0x6a   : > { %3394 = vmatprep.subr.bf16.mxu1 %v3956_v5  ;;  %v3638_v18 = vld [vmem:[%s4133_s29 + $0x1c] ss:$12 sps:$4 sm:$0xff]   ;;  %v3646_v19 = vld [vmem:[%s4133_s29 + $0x80] ss:$12 sps:$4 sm:$0xff]   ;;  %v3640_v21 = vld [vmem:[%s4133_s29 + $0x18] ss:$12 sps:$4 sm:$0xff]  }
  0x6b   : > { %v3647_v20 = vld [vmem:[%s4133_s29 + $0x68] ss:$12 sps:$4 sm:$0xff]   ;;  %v3641_v22 = vld [vmem:[%s4133_s29 + $0x4] ss:$12 sps:$4 sm:$0xff]   ;;  %v3643_v24 = vld [vmem:[%s4133_s29] ss:$12 sps:$4 sm:$0xff]  }
  0x6c   : > { %821 = vmatpush1.bf16.msra.mxu0 %v3625_v7  ;;  %v3648_v23 = vld [vmem:[%s4133_s29 + $0x50] ss:$12 sps:$4 sm:$0xff]   ;;  %s4778_s24 = sld [smem:[#allocation18_spill]]  ;;  %v3649_v27 = vld [vmem:[%s4133_s29 + $0x38] ss:$12 sps:$4 sm:$0xff]   ;;  %vm3957_vm0 = vmmov 0  }
  0x6d   : > { %822 = vmatprep.subr.bf16.mxu0 %v3626_v8  ;;  %3395 = vmatpush3.bf16.msra.mxu1 %v3645_v14  ;;  %v3650_v29 = vld [vmem:[%s4133_s29 + $0x20] ss:$12 sps:$4 sm:$0xff]   ;;  %v3651_v30 = vld [vmem:[%s4133_s29 + $0x8] ss:$12 sps:$4 sm:$0xff]   ;;  %v4253_v32 = vshrl.u32 %v675_v31, 7  ;;  %vm908_vm1 = vcmask 261120  }
  0x6e   : > { %3396 = vmatprep.subr.bf16.mxu1 %v3956_v5  ;;  %3408 = vmatprep.mubr.msk.bf16.mxu1 %vm3957_vm0, %v3956_v5  ;;  %v673_v34 = vld [vmem:[%s4167_s1] sm:$0x7]  ;;  %s3958_s29 = smov 96   ;;  %vm1029_vm2 = vcmask 1043456   ;;  %vm1001_vm3 = vcmask 64512   ;;  %s3959_s1 = smov 64  }
  0x6f   : > { %v681_v33 = vsub.s32 1, %v4253_v32  ;;  %v677_v37 = vsub.s32 0, %v4253_v32  ;;  %v685_v52 = vsub.s32 2, %v4253_v32  ;;  %s3960_s14 = smov 32  }
  0x70   : > { %823 = vmatpush1.bf16.msra.mxu0 %v3628_v9 }
  0x71   : > { %824 = vmatprep.subr.bf16.mxu0 %v3629_v10  ;;  %3397 = vmatpush3.bf16.msra.mxu1 %v3646_v19  ;;  %v682_v35 = vrot.slane %v673_v34, %v681_v33  ;;  %v678_v41 = vrot.slane %v673_v34, %v677_v37  ;;  %v686_v53 = vrot.slane %v673_v34, %v685_v52 }
  0x72   : > { %3398 = vmatprep.subr.bf16.mxu1 %v3956_v5  ;;  %v4229_v25 = vld [vmem:[%s4778_s24] sm:$0xff]  ;;  %v4234_v26 = vld [vmem:[%s4778_s24 + $0x8] sm:$0xff] }
  0x73   : > { %v640_v28 = vpack.c.bf16 %v4234_v26, %v4229_v25 }
  0x74   : > { %825 = vmatpush1.bf16.msra.mxu0 %v3631_v11 }
  0x75   : > { %826 = vmatprep.subr.bf16.mxu0 %v3632_v12  ;;  %3399 = vmatpush3.bf16.msra.mxu1 %v3647_v20 }
  0x76   : > { %3400 = vmatprep.subr.bf16.mxu1 %v3956_v5 }
  0x78   : > { %827 = vmatpush1.bf16.msra.mxu0 %v3634_v15 }
  0x79   : > { %828 = vmatprep.subr.bf16.mxu0 %v3635_v16  ;;  %3401 = vmatpush3.bf16.msra.mxu1 %v3648_v23 }
  0x7a   : > { %3402 = vmatprep.subr.bf16.mxu1 %v3956_v5 }
  0x7c   : > { %829 = vmatpush1.bf16.msra.mxu0 %v3637_v17 }
  0x7d   : > { %830 = vmatprep.subr.bf16.mxu0 %v3638_v18  ;;  %3403 = vmatpush3.bf16.msra.mxu1 %v3649_v27 }
  0x7e   : > { %3404 = vmatprep.subr.bf16.mxu1 %v3956_v5 }
  0x80   : > { %831 = vmatpush1.bf16.msra.mxu0 %v3640_v21 }
  0x81   : > { %832 = vmatprep.subr.bf16.mxu0 %v3641_v22  ;;  %3405 = vmatpush3.bf16.msra.mxu1 %v3650_v29 }
  0x82   : > { %3406 = vmatprep.subr.bf16.mxu1 %v3956_v5 }
  0x84   : > { %833 = vmatpush1.bf16.msra.mxu0 %v3643_v24 }
  0x85   : > { %3412 = vmatprep.subr.bf16.mxu0 %v3956_v5  ;;  %3407 = vmatpush3.bf16.msra.mxu1 %v3651_v30 }
  0x86   : > { %3418 = vmatprep.subr.bf16.mxu1 %v3956_v5 }
  0x87   : > { %851 = vmatmul.mubr.bf16.vlgmr.msra.gmra.mxu0 %v640_v28 }
  0x88   : > { %3414 = vmatprep.mubr.msk.bf16.mxu0 %vm3957_vm0, %v3956_v5  ;;  %3409 = vmatmul.mubr.bf16.vlgmr.msra.gmra.mxu1 %v640_v28 }
  0x89   : > { %3420 = vmatprep.mubr.msk.bf16.mxu1 %vm3957_vm0, %v3956_v5 }
 0x147   : > { %v852_v36 = vpop.f32.mrf.mxu0 }
 0x148   : > { %v853_v46 = vadd.f32 %v852_v36, %v678_v41  ;;  %v895_v54 = vpop.f32.mrf.mxu1 }
 0x149   : > { %v854_v38 = vpop.f32.mrf.mxu0  ;;  %v896_v56 = vadd.f32 %v895_v54, %v686_v53 }
 0x14a   : > { %v855_v39 = vadd.f32 %v854_v38, %v682_v35  ;;  %v4273_v49 = vpack.c.bf16 %v853_v46, %v853_v46  ;;  %v3410_v55 = vpop.f32.mrf.mxu1 }
 0x14b   : > { %v856_v40 = vpop.f32.mrf.mxu0  ;;  %v4289_v60 = vpack.c.bf16 %v896_v56, %v896_v56 }
 0x14c   : > { %v4262_v42 = vpack.c.bf16 %v855_v39, %v855_v39  ;;  %v857_v50 = vadd.f32 %v856_v40, %v678_v41  ;;  %v898_v57 = vpop.f32.mrf.mxu1 }
 0x14d   : > { %v858_v43 = vpop.f32.mrf.mxu0  ;;  %v899_v58 = vadd.f32 %v898_v57, %v686_v53  ;;  %v1031_v62 = vsel %vm1029_vm2, %v4289_v60, 0 }
 0x14e   : > { %v859_v44 = vadd.f32 %v858_v43, %v682_v35  ;;  %v913_v45 = vsel %vm908_vm1, %v4262_v42, 0  ;;  %v4280_v51 = vpack.c.bf16 %v857_v50, %v857_v50  ;;  %v3411_v59 = vpop.f32.mrf.mxu1 }
 0x14f   : > { %3413 = vmatpush3.bf16.xpose.msra.mxu0 %v913_v45  ;;  %v4291_v61 = vpack.c.bf16 %v899_v58, %v899_v58 }
 0x150   : > { %v4266_v47 = vpack.c.bf16 %v859_v44, %v859_v44  ;;  %3424 = vmatprep.subr.bf16.mxu0 %v3956_v5 }
 0x151   : > { %v1077_v63 = vsel %vm1029_vm2, %v4291_v61, 0 }
 0x152   : > { %1180 = vrot.lane.b32.xlu1 %v4266_v47, %s3958_s29  ;;  %v959_v48 = vsel %vm908_vm1, %v4266_v47, 0 }
 0x153   : > { %3419 = vmatpush3.bf16.xpose.msra.mxu1 %v959_v48 }
 0x154   : > { %3430 = vmatprep.subr.bf16.mxu1 %v3956_v5 }
 0x156   : > { %3415 = vmatmul.mubr.msk.bf16.vlgmr.msra.gmra.mxu0 %vm908_vm1, %v4273_v49 }
 0x157   : > { %3426 = vmatprep.mubr.msk.bf16.mxu0 %vm3957_vm0, %v3956_v5  ;;  %3425 = vmatpush3.bf16.msra.mxu0 %v1031_v62 }
 0x158   : > { %3436 = vmatprep.subr.bf16.mxu0 %v3956_v5 }
 0x15a   : > { %3421 = vmatmul.mubr.msk.bf16.vlgmr.msra.gmra.mxu1 %vm908_vm1, %v4280_v51 }
 0x15b   : > { %3432 = vmatprep.mubr.msk.bf16.mxu1 %vm3957_vm0, %v3956_v5  ;;  %3431 = vmatpush3.bf16.msra.mxu1 %v1077_v63 }
 0x15c   : > { %3442 = vmatprep.subr.bf16.mxu1 %v3956_v5 }
 0x1c4   : > { %v1181_v22 = vpop.permute.xlu1 %1180 }
 0x1c5   : > { %v1186_v38 = vsel %vm908_vm1, %v1181_v22, 0 }
 0x216   : > { %v949_v0 = vpop.f32.mrf.mxu0 }
 0x217   : > { %v1002_v1 = vsel %vm1001_vm3, %v949_v0, -inf }
 0x218   : > { %1003 = vmax.xlane.f32.xlu0 %v1002_v1  ;;  %v3416_v2 = vpop.f32.mrf.mxu0 }
 0x21a   : > { %v952_v3 = vpop.f32.mrf.mxu0  ;;  %v995_v6 = vpop.f32.mrf.mxu1 }
 0x21b   : > { %v1005_v7 = vsel %vm1001_vm3, %v995_v6, -inf }
 0x21c   : > { %v3422_v8 = vpop.f32.mrf.mxu1  ;;  %1006 = vmax.xlane.f32.xlu0 %v1005_v7  ;;  %v3417_v9 = vpop.f32.mrf.mxu0 }
 0x21e   : > { %v998_v10 = vpop.f32.mrf.mxu1 }
 0x220   : > { %v3423_v11 = vpop.f32.mrf.mxu1 }
 0x232   : > { %1128 = vrot.lane.b32.xlu0 %v4262_v42, %s3958_s29 }
 0x2a1   : > { %v1004_v12 = vpop.xlane.xlu0 %1003 }
 0x2a2   : > { %v1008_v13 = vsub.f32 %v949_v0, %v1004_v12 }
 0x2a4   : > { %v1010_v14 = vmul.f32 1.442695, %v1008_v13 }
 0x2a5   : > { %v1007_v15 = vpop.xlane.xlu0 %1006 }
 0x2a6   : > { %3740 = vpow2.f32 %v1010_v14  ;;  %v1009_v16 = vsub.f32 %v995_v6, %v1007_v15 }
 0x2a8   : > { %v1012_v17 = vmul.f32 1.442695, %v1009_v16 }
 0x2a9   : > { %v1129_v29 = vpop.permute.xlu0 %1128 }
 0x2aa   : > { %3742 = vpow2.f32 %v1012_v17  ;;  %v1134_v34 = vsel %vm908_vm1, %v1129_v29, 0  ;;  %v3652_v29 = vld [vmem:[%s4141_s11 + $0x8] sm:$0xff]  }
 0x2b3   : > { %v3741_v18 = vpop.eup %3740 }
 0x2b4   : > { %v1014_v19 = vsel %vm1001_vm3, %v3741_v18, 0.0 }
 0x2b5   : > { %1015 = vadd.xlane.f32.xlu1 %v1014_v19 }
 0x2b7   : > { %v3743_v20 = vpop.eup %3742 }
 0x2b8   : > { %v1017_v21 = vsel %vm1001_vm3, %v3743_v20, 0.0 }
 0x2b9   : > { %1018 = vadd.xlane.f32.xlu1 %v1017_v21 }
 0x2ca   : > { %1125 = vrot.lane.b32.xlu1 %v4273_v49, %s3958_s29 }
 0x2ce   : > { %1177 = vrot.lane.b32.xlu1 %v4280_v51, %s3958_s29 }
 0x33e   : > { %v1016_v23 = vpop.xlane.xlu1 %1015 }
 0x33f   : > { %3744 = vrcp.f32 %v1016_v23  ;;  %v3654_v23 = vld [vmem:[%s4141_s11 + $0x18] sm:$0xff]  }
 0x342   : > { %v1019_v24 = vpop.xlane.xlu1 %1018 }
 0x343   : > { %3746 = vrcp.f32 %v1019_v24 }
 0x346   : > { %v1126_v39 = vpop.permute.xlu1 %1125 }
 0x34a   : > { %v1178_v40 = vpop.permute.xlu1 %1177 }
 0x34c   : > { %v3745_v27 = vpop.eup %3744 }
 0x34d   : > { %v1022_v28 = vmul.f32 %v3745_v27, %v3741_v18 }
 0x34f   : > { %v1024_v30 = vpack.c.bf16 %v1022_v28, %v1022_v28 }
 0x350   : > { %v3747_v31 = vpop.eup %3746 }
 0x351   : > { %3427 = vmatmul.mubr.msk.bf16.vlgmr.msra.gmra.mxu0 %vm1001_vm3, %v1024_v30  ;;  %v1023_v35 = vmul.f32 %v3747_v31, %v3743_v20 }
 0x352   : > { %3437 = vmatpush3.bf16.xpose.msra.mxu0 %v1134_v34  ;;  %3438 = vmatprep.mubr.msk.bf16.mxu0 %vm3957_vm0, %v3956_v5  ;;  %v3653_v34 = vld [vmem:[%s4141_s11] sm:$0xff]  }
 0x353   : > { %v1025_v36 = vpack.c.bf16 %v1023_v35, %v1023_v35  ;;  %3448 = vmatprep.subr.bf16.mxu0 %v3956_v5 }
 0x355   : > { %3433 = vmatmul.mubr.msk.bf16.vlgmr.msra.gmra.mxu1 %vm1001_vm3, %v1025_v36 }
 0x356   : > { %3443 = vmatpush3.bf16.xpose.msra.mxu1 %v1186_v38  ;;  %3444 = vmatprep.mubr.msk.bf16.mxu1 %vm3957_vm0, %v3956_v5 }
 0x357   : > { %3454 = vmatprep.subr.bf16.mxu1 %v3956_v5 }
 0x359   : > { %3439 = vmatmul.mubr.msk.bf16.vlgmr.msra.gmra.mxu0 %vm908_vm1, %v1126_v39  ;;  %v3655_v39 = vld [vmem:[%s4141_s11 + $0x10] sm:$0xff]  }
 0x35a   : > { %3450 = vmatprep.mubr.msk.bf16.mxu0 %vm3957_vm0, %v3956_v5 }
 0x35d   : > { %3445 = vmatmul.mubr.msk.bf16.vlgmr.msra.gmra.mxu1 %vm908_vm1, %v1178_v40 }
 0x35e   : > { %3456 = vmatprep.mubr.msk.bf16.mxu1 %vm3957_vm0, %v3956_v5 }
 0x411   : > { %v4325_v41 = vpop.f32.mrf.mxu0 }
 0x413   : > { %v3428_v43 = vpop.f32.mrf.mxu0 }
 0x415   : > { %v1070_v44 = vpop.f32.mrf.mxu0  ;;  %v4327_v45 = vpop.f32.mrf.mxu1 }
 0x416   : > { %v1119_v46 = vpack.c.bf16 %v4327_v45, %v4325_v41 }
 0x417   : > { %v3429_v48 = vpop.f32.mrf.mxu0  ;;  %v3434_v50 = vpop.f32.mrf.mxu1 }
 0x419   : > { %v1116_v53 = vpop.f32.mrf.mxu1  ;;  %v1170_v54 = vpop.f32.mrf.mxu0 }
 0x41a   : > { %v1228_v55 = vsel %vm1001_vm3, %v1170_v54, -inf }
 0x41b   : > { %v3435_v56 = vpop.f32.mrf.mxu1  ;;  %1229 = vmax.xlane.f32.xlu0 %v1228_v55  ;;  %v3440_v57 = vpop.f32.mrf.mxu0 }
 0x41d   : > { %v1173_v58 = vpop.f32.mrf.mxu0  ;;  %v1222_v59 = vpop.f32.mrf.mxu1 }
 0x41e   : > { %v1231_v62 = vsel %vm1001_vm3, %v1222_v59, -inf }
 0x41f   : > { %1232 = vmax.xlane.f32.xlu1 %v1231_v62  ;;  %v3441_v63 = vpop.f32.mrf.mxu0  ;;  %v3446_v0 = vpop.f32.mrf.mxu1 }
 0x421   : > { %v1225_v1 = vpop.f32.mrf.mxu1 }
 0x423   : > { %v3447_v2 = vpop.f32.mrf.mxu1 }
 0x430   : > { %1302 = vrot.lane.b32.xlu1 %v4291_v61, %s3958_s29 }
 0x434   : > { %1469 = vrot.lane.b32.xlu1 %v4262_v42, %s3959_s1 }
 0x438   : > { %1519 = vrot.lane.b32.xlu1 %v4266_v47, %s3959_s1 }
 0x43c   : > { %1517 = vrot.lane.b32.xlu1 %v4280_v51, %s3959_s1 }
 0x4a4   : > { %v1230_v3 = vpop.xlane.xlu0 %1229 }
 0x4a5   : > { %v1234_v6 = vsub.f32 %v1170_v54, %v1230_v3 }
 0x4a7   : > { %v1236_v7 = vmul.f32 1.442695, %v1234_v6 }
 0x4a8   : > { %v1233_v8 = vpop.xlane.xlu1 %1232 }
 0x4a9   : > { %3748 = vpow2.f32 %v1236_v7  ;;  %v1235_v9 = vsub.f32 %v1222_v59, %v1233_v8 }
 0x4ab   : > { %v1238_v10 = vmul.f32 1.442695, %v1235_v9 }
 0x4ac   : > { %v1303_v11 = vpop.permute.xlu1 %1302 }
 0x4ad   : > { %3750 = vpow2.f32 %v1238_v10  ;;  %v1308_v12 = vsel %vm1029_vm2, %v1303_v11, 0 }
 0x4ae   : > { %3455 = vmatpush3.bf16.msra.mxu1 %v1308_v12 }
 0x4af   : > { %3468 = vmatprep.subr.bf16.mxu1 %v3956_v5 }
 0x4b0   : > { %v1470_v31 = vpop.permute.xlu1 %1469 }
 0x4b1   : > { %v1475_v50 = vsel %vm908_vm1, %v1470_v31, 0 }
 0x4b4   : > { %v1520_v35 = vpop.permute.xlu1 %1519 }
 0x4b5   : > { %v1525_v36 = vsel %vm908_vm1, %v1520_v35, 0 }
 0x4b6   : > { %v3749_v13 = vpop.eup %3748 }
 0x4b7   : > { %v1240_v14 = vsel %vm1001_vm3, %v3749_v13, 0.0 }
 0x4b8   : > { %1241 = vadd.xlane.f32.xlu0 %v1240_v14  ;;  %v1518_v38 = vpop.permute.xlu1 %1517 }
 0x4ba   : > { %v3751_v15 = vpop.eup %3750 }
 0x4bb   : > { %v1243_v16 = vsel %vm1001_vm3, %v3751_v15, 0.0 }
 0x4bc   : > { %1244 = vadd.xlane.f32.xlu0 %v1243_v16 }
 0x4d2   : > { %1253 = vrot.lane.b32.xlu0 %v4289_v60, %s3958_s29 }
 0x4d6   : > { %1467 = vrot.lane.b32.xlu0 %v4273_v49, %s3959_s1 }
 0x541   : > { %v1242_v17 = vpop.xlane.xlu0 %1241 }
 0x542   : > { %3752 = vrcp.f32 %v1242_v17 }
 0x545   : > { %v1245_v18 = vpop.xlane.xlu0 %1244 }
 0x546   : > { %3754 = vrcp.f32 %v1245_v18 }
 0x549   : > { %v1254_v19 = vpop.permute.xlu0 %1253 }
 0x54a   : > { %v1259_v20 = vsel %vm1029_vm2, %v1254_v19, 0 }
 0x54b   : > { %3449 = vmatpush3.bf16.msra.mxu0 %v1259_v20 }
 0x54c   : > { %3460 = vmatprep.subr.bf16.mxu0 %v3956_v5 }
 0x54d   : > { %v1468_v56 = vpop.permute.xlu0 %1467 }
 0x54f   : > { %v3753_v21 = vpop.eup %3752 }
 0x550   : > { %v1248_v22 = vmul.f32 %v3753_v21, %v3749_v13 }
 0x552   : > { %v1250_v24 = vpack.c.bf16 %v1248_v22, %v1248_v22 }
 0x553   : > { %v3755_v27 = vpop.eup %3754 }
 0x554   : > { %3451 = vmatmul.mubr.msk.bf16.vlgmr.msra.gmra.mxu0 %vm1001_vm3, %v1250_v24  ;;  %v1249_v28 = vmul.f32 %v3755_v27, %v3751_v15 }
 0x555   : > { %3461 = vmatpush3.bf16.msra.mxu0 %v3654_v23  ;;  %3464 = vmatprep.mubr.msk.bf16.mxu0 %vm3957_vm0, %v3956_v5 }
 0x556   : > { %v1251_v30 = vpack.c.bf16 %v1249_v28, %v1249_v28  ;;  %3462 = vmatprep.subr.bf16.mxu0 %v3956_v5 }
 0x558   : > { %3457 = vmatmul.mubr.msk.bf16.vlgmr.msra.gmra.mxu1 %vm1001_vm3, %v1251_v30 }
 0x559   : > { %3469 = vmatpush3.bf16.msra.mxu1 %v3652_v29  ;;  %3472 = vmatprep.mubr.msk.bf16.mxu1 %vm3957_vm0, %v3956_v5 }
 0x55a   : > { %3470 = vmatprep.subr.bf16.mxu1 %v3956_v5  ;;  %3463 = vmatpush3.bf16.msra.mxu0 %v3655_v39 }
 0x55b   : > { %3476 = vmatprep.subr.bf16.mxu0 %v3956_v5 }
 0x55d   : > { %3471 = vmatpush3.bf16.msra.mxu1 %v3653_v34 }
 0x55e   : > { %3482 = vmatprep.subr.bf16.mxu1 %v3956_v5 }
 0x560   : > { %3473 = vmatmul.mubr.msk.bf16.vlgmr.msra.gmra.mxu1 %vm908_vm1, %v1119_v46 }
 0x561   : > { %3483 = vmatpush3.bf16.xpose.msra.mxu1 %v1525_v36  ;;  %3484 = vmatprep.mubr.msk.bf16.mxu1 %vm3957_vm0, %v3956_v5 }
 0x562   : > { %3494 = vmatprep.subr.bf16.mxu1 %v3956_v5 }
 0x568   : > { %3485 = vmatmul.mubr.msk.bf16.vlgmr.msra.gmra.mxu1 %vm908_vm1, %v1518_v38 }
 0x569   : > { %3496 = vmatprep.mubr.msk.bf16.mxu1 %vm3957_vm0, %v3956_v5 }
 0x614   : > { %v1295_v40 = vpop.f32.mrf.mxu0 }
 0x616   : > { %v3452_v41 = vpop.f32.mrf.mxu0 }
 0x618   : > { %v1298_v43 = vpop.f32.mrf.mxu0  ;;  %v1344_v44 = vpop.f32.mrf.mxu1 }
 0x619   : > { %v1350_v45 = vpack.c.bf16 %v1344_v44, %v1295_v40 }
 0x61a   : > { %v3453_v46 = vpop.f32.mrf.mxu0  ;;  %v3458_v48 = vpop.f32.mrf.mxu1 }
 0x61b   : > { %3465 = vmatmul.mubr.msk.bf16.vlgmr.msra.gmra.mxu0 %vm908_vm1, %v1350_v45  ;;  %v3656_v45 = vld [vmem:[%s4141_s11 + $0x28] sm:$0xff]   ;;  %v3657_v46 = vld [vmem:[%s4141_s11 + $0x20] sm:$0xff]  }
 0x61c   : > { %3477 = vmatpush3.bf16.xpose.msra.mxu0 %v1475_v50  ;;  %v1347_v53 = vpop.f32.mrf.mxu1  ;;  %3478 = vmatprep.mubr.msk.bf16.mxu0 %vm3957_vm0, %v3956_v5 }
 0x61d   : > { %3488 = vmatprep.subr.bf16.mxu0 %v3956_v5 }
 0x61e   : > { %v3459_v54 = vpop.f32.mrf.mxu1 }
 0x620   : > { %v4381_v55 = vpop.f32.mrf.mxu1 }
 0x622   : > { %v3474_v57 = vpop.f32.mrf.mxu1 }
 0x623   : > { %3479 = vmatmul.mubr.msk.bf16.vlgmr.msra.gmra.mxu0 %vm908_vm1, %v1468_v56 }
 0x624   : > { %v4384_v58 = vpop.f32.mrf.mxu1  ;;  %3490 = vmatprep.mubr.msk.bf16.mxu0 %vm3957_vm0, %v3956_v5 }
 0x626   : > { %v3475_v59 = vpop.f32.mrf.mxu1 }
 0x628   : > { %v1561_v62 = vpop.f32.mrf.mxu1 }
 0x629   : > { %v1570_v63 = vsel %vm1001_vm3, %v1561_v62, -inf }
 0x62a   : > { %1571 = vmax.xlane.f32.xlu1 %v1570_v63  ;;  %v3486_v0 = vpop.f32.mrf.mxu1 }
 0x62c   : > { %v1564_v1 = vpop.f32.mrf.mxu1 }
 0x62e   : > { %v3487_v2 = vpop.f32.mrf.mxu1 }
 0x63b   : > { %1639 = vrot.lane.b32.xlu1 %v4291_v61, %s3959_s1 }
 0x63f   : > { %1752 = vrot.lane.b32.xlu1 %v4262_v42, %s3960_s14 }
 0x643   : > { %1802 = vrot.lane.b32.xlu1 %v4266_v47, %s3960_s14 }
 0x647   : > { %1800 = vrot.lane.b32.xlu1 %v4280_v51, %s3960_s14 }
 0x6b3   : > { %v1572_v3 = vpop.xlane.xlu1 %1571 }
 0x6b4   : > { %v1574_v8 = vsub.f32 %v1561_v62, %v1572_v3 }
 0x6b6   : > { %v1577_v9 = vmul.f32 1.442695, %v1574_v8 }
 0x6b7   : > { %v1640_v6 = vpop.permute.xlu1 %1639 }
 0x6b8   : > { %v1645_v7 = vsel %vm1029_vm2, %v1640_v6, 0  ;;  %3756 = vpow2.f32 %v1577_v9 }
 0x6b9   : > { %3495 = vmatpush3.bf16.msra.mxu1 %v1645_v7 }
 0x6ba   : > { %3508 = vmatprep.subr.bf16.mxu1 %v3956_v5 }
 0x6bb   : > { %v1753_v28 = vpop.permute.xlu1 %1752 }
 0x6bc   : > { %v1758_v30 = vsel %vm908_vm1, %v1753_v28, 0 }
 0x6bf   : > { %v1803_v57 = vpop.permute.xlu1 %1802 }
 0x6c0   : > { %v1808_v0 = vsel %vm908_vm1, %v1803_v57, 0  ;;  %v3220_v57 = vld [vmem:[%s4779_s19] ss:$0 sm:$0xff] }
 0x6c3   : > { %v1801_v3 = vpop.permute.xlu1 %1800 }
 0x6c5   : > { %v3757_v51 = vpop.eup %3756 }
 0x6c6   : > { %v1582_v16 = vsel %vm1001_vm3, %v3757_v51, 0.0 }
 0x6db   : > { %v4399_v10 = vpop.f32.mrf.mxu0 }
 0x6dd   : > { %v3466_v11 = vpop.f32.mrf.mxu0 }
 0x6df   : > { %v4401_v42 = vpop.f32.mrf.mxu0 }
 0x6e1   : > { %v3467_v12 = vpop.f32.mrf.mxu0 }
 0x6e2   : > { %v1461_v12 = vadd.f32 %v4381_v55, %v4399_v10 }
 0x6e3   : > { %v1511_v47 = vpop.f32.mrf.mxu0 }
 0x6e4   : > { %v1567_v13 = vsel %vm1001_vm3, %v1511_v47, -inf }
 0x6e5   : > { %1568 = vmax.xlane.f32.xlu0 %v1567_v13  ;;  %v3480_v14 = vpop.f32.mrf.mxu0 }
 0x6e6   : > { %v1464_v14 = vadd.f32 %v4384_v58, %v4401_v42 }
 0x6e7   : > { %v1514_v15 = vpop.f32.mrf.mxu0 }
 0x6e9   : > { %1583 = vadd.xlane.f32.xlu0 %v1582_v16  ;;  %v3481_v17 = vpop.f32.mrf.mxu0 }
 0x76e   : > { %v1569_v18 = vpop.xlane.xlu0 %1568 }
 0x76f   : > { %v1573_v19 = vsub.f32 %v1511_v47, %v1569_v18 }
 0x771   : > { %v1575_v20 = vmul.f32 1.442695, %v1573_v19 }
 0x772   : > { %v1584_v21 = vpop.xlane.xlu0 %1583 }
 0x773   : > { %3758 = vpow2.f32 %v1575_v20 }
 0x774   : > { %3760 = vrcp.f32 %v1584_v21 }
 0x780   : > { %v3759_v22 = vpop.eup %3758 }
 0x781   : > { %v3761_v23 = vpop.eup %3760  ;;  %v1579_v24 = vsel %vm1001_vm3, %v3759_v22, 0.0 }
 0x782   : > { %1580 = vadd.xlane.f32.xlu0 %v1579_v24  ;;  %v1588_v27 = vmul.f32 %v3761_v23, %v3757_v51 }
 0x784   : > { %v1590_v29 = vpack.c.bf16 %v1588_v27, %v1588_v27 }
 0x786   : > { %3497 = vmatmul.mubr.msk.bf16.vlgmr.msra.gmra.mxu1 %vm1001_vm3, %v1590_v29 }
 0x787   : > { %3509 = vmatpush3.bf16.xpose.msra.mxu1 %v1758_v30  ;;  %3510 = vmatprep.mubr.msk.bf16.mxu1 %vm3957_vm0, %v3956_v5 }
 0x788   : > { %3520 = vmatprep.subr.bf16.mxu1 %v3956_v5 }
 0x798   : > { %1591 = vrot.lane.b32.xlu0 %v4289_v60, %s3959_s1 }
 0x79c   : > { %1750 = vrot.lane.b32.xlu0 %v4273_v49, %s3960_s14 }
 0x80b   : > { %v1581_v31 = vpop.xlane.xlu0 %1580 }
 0x80c   : > { %3762 = vrcp.f32 %v1581_v31 }
 0x80f   : > { %v1592_v34 = vpop.permute.xlu0 %1591 }
 0x810   : > { %v1597_v35 = vsel %vm1029_vm2, %v1592_v34, 0 }
 0x811   : > { %3489 = vmatpush3.bf16.msra.mxu0 %v1597_v35 }
 0x812   : > { %3500 = vmatprep.subr.bf16.mxu0 %v3956_v5 }
 0x813   : > { %v1751_v36 = vpop.permute.xlu0 %1750 }
 0x814   : > { %3511 = vmatmul.mubr.msk.bf16.vlgmr.msra.gmra.mxu1 %vm908_vm1, %v1751_v36 }
 0x815   : > { %3522 = vmatprep.mubr.msk.bf16.mxu1 %vm3957_vm0, %v3956_v5 }
 0x819   : > { %v3763_v38 = vpop.eup %3762 }
 0x81a   : > { %v1587_v39 = vmul.f32 %v3763_v38, %v3759_v22 }
 0x81c   : > { %v1589_v40 = vpack.c.bf16 %v1587_v39, %v1587_v39  ;;  %v3658_v39 = vld [vmem:[%s4141_s11 + $0x38] sm:$0xff]  }
 0x81e   : > { %3491 = vmatmul.mubr.msk.bf16.vlgmr.msra.gmra.mxu0 %vm1001_vm3, %v1589_v40  ;;  %v3659_v40 = vld [vmem:[%s4141_s11 + $0x30] sm:$0xff]  }
 0x81f   : > { %3504 = vmatprep.mubr.msk.bf16.mxu0 %vm3957_vm0, %v3956_v5  ;;  %3501 = vmatpush3.bf16.msra.mxu0 %v3656_v45 }
 0x820   : > { %3502 = vmatprep.subr.bf16.mxu0 %v3956_v5 }
 0x823   : > { %3503 = vmatpush3.bf16.msra.mxu0 %v3657_v46 }
 0x824   : > { %3514 = vmatprep.subr.bf16.mxu0 %v3956_v5 }
 0x846   : > { %v1681_v49 = vpop.f32.mrf.mxu1 }
 0x848   : > { %v3498_v41 = vpop.f32.mrf.mxu1 }
 0x84a   : > { %v1684_v43 = vpop.f32.mrf.mxu1 }
 0x84c   : > { %v3499_v44 = vpop.f32.mrf.mxu1 }
 0x8d4   : > { %v1794_v48 = vpop.f32.mrf.mxu1 }
 0x8d5   : > { %v1850_v50 = vsel %vm1001_vm3, %v1794_v48, -inf }
 0x8d6   : > { %1851 = vmax.xlane.f32.xlu0 %v1850_v50  ;;  %v3512_v53 = vpop.f32.mrf.mxu1 }
 0x8d8   : > { %v1797_v54 = vpop.f32.mrf.mxu1 }
 0x8da   : > { %v3513_v56 = vpop.f32.mrf.mxu1 }
 0x8de   : > { %v1633_v59 = vpop.f32.mrf.mxu0 }
 0x8df   : > { %v1687_v62 = vpack.c.bf16 %v1681_v49, %v1633_v59 }
 0x8e0   : > { %v3492_v63 = vpop.f32.mrf.mxu0 }
 0x8e1   : > { %3505 = vmatmul.mubr.msk.bf16.vlgmr.msra.gmra.mxu0 %vm908_vm1, %v1687_v62 }
 0x8e2   : > { %3515 = vmatpush3.bf16.xpose.msra.mxu0 %v1808_v0  ;;  %v1636_v1 = vpop.f32.mrf.mxu0  ;;  %3516 = vmatprep.mubr.msk.bf16.mxu0 %vm3957_vm0, %v3956_v5 }
 0x8e3   : > { %3526 = vmatprep.subr.bf16.mxu0 %v3956_v5 }
 0x8e4   : > { %v3493_v2 = vpop.f32.mrf.mxu0 }
 0x8e9   : > { %3517 = vmatmul.mubr.msk.bf16.vlgmr.msra.gmra.mxu0 %vm908_vm1, %v1801_v3  ;;  %v3660_v3 = vld [vmem:[%s4173_s9 + $0xe0] ss:$16 sps:$4 sm:$0xff]  }
 0x8ea   : > { %3528 = vmatprep.mubr.msk.bf16.mxu0 %vm3957_vm0, %v3956_v5 }
 0x95f   : > { %v1852_v6 = vpop.xlane.xlu0 %1851 }
 0x960   : > { %v1856_v7 = vsub.f32 %v1794_v48, %v1852_v6  ;;  %v3662_v6 = vld [vmem:[%s4173_s9 + $0xe4] ss:$16 sps:$4 sm:$0xff]  }
 0x962   : > { %v1858_v8 = vmul.f32 1.442695, %v1856_v7  ;;  %v3663_v7 = vld [vmem:[%s4173_s9 + $0xe8] ss:$16 sps:$4 sm:$0xff]  }
 0x964   : > { %3764 = vpow2.f32 %v1858_v8  ;;  %v3665_v8 = vld [vmem:[%s4173_s9 + $0xec] ss:$16 sps:$4 sm:$0xff]  }
 0x971   : > { %v3765_v9 = vpop.eup %3764 }
 0x972   : > { %v1862_v11 = vsel %vm1001_vm3, %v3765_v9, 0.0 }
 0x973   : > { %1863 = vadd.xlane.f32.xlu0 %v1862_v11 }
 0x9a1   : > { %v1741_v47 = vpop.f32.mrf.mxu0 }
 0x9a2   : > { %v1748_v13 = vadd.f32 %v1741_v47, %v1461_v12 }
 0x9a3   : > { %v3506_v51 = vpop.f32.mrf.mxu0 }
 0x9a5   : > { %v1744_v15 = vpop.f32.mrf.mxu0 }
 0x9a6   : > { %v1749_v16 = vadd.f32 %v1744_v15, %v1464_v14  ;;  %v3668_v14 = vld [vmem:[%s4173_s9 + $0xc4] ss:$16 sps:$4 sm:$0xff]   ;;  %v3671_v15 = vld [vmem:[%s4173_s9 + $0xcc] ss:$16 sps:$4 sm:$0xff]  }
 0x9a7   : > { %v3507_v17 = vpop.f32.mrf.mxu0 }
 0x9a8   : > { %v3669_v17 = vld [vmem:[%s4173_s9 + $0xc8] ss:$16 sps:$4 sm:$0xff]  }
 0x9a9   : > { %v1844_v18 = vpop.f32.mrf.mxu0 }
 0x9aa   : > { %v1853_v19 = vsel %vm1001_vm3, %v1844_v18, -inf }
 0x9ab   : > { %1854 = vmax.xlane.f32.xlu1 %v1853_v19  ;;  %v3518_v20 = vpop.f32.mrf.mxu0  ;;  %v3677_v19 = vld [vmem:[%s4173_s9 + $0xac] ss:$16 sps:$4 sm:$0xff]  }
 0x9ac   : > { %v3672_v20 = vld [vmem:[%s4173_s9 + $0xa0] ss:$16 sps:$4 sm:$0xff]  }
 0x9ad   : > { %v1847_v21 = vpop.f32.mrf.mxu0 }
 0x9ae   : > { %v3675_v21 = vld [vmem:[%s4173_s9 + $0xa8] ss:$16 sps:$4 sm:$0xff]  }
 0x9af   : > { %v3519_v22 = vpop.f32.mrf.mxu0 }
 0x9b0   : > { %v3680_v22 = vld [vmem:[%s4173_s9 + $0x84] ss:$16 sps:$4 sm:$0xff]  }
 0x9bc   : > { %1922 = vrot.lane.b32.xlu1 %v4291_v61, %s3960_s14 }
 0x9fc   : > { %v1864_v28 = vpop.xlane.xlu0 %1863 }
 0xa34   : > { %v1855_v55 = vpop.xlane.xlu1 %1854 }
 0xa35   : > { %v1857_v10 = vsub.f32 %v1844_v18, %v1855_v55  ;;  %v3674_v18 = vld [vmem:[%s4173_s9 + $0xa4] ss:$16 sps:$4 sm:$0xff]   ;;  %v3678_v55 = vld [vmem:[%s4173_s9 + $0x80] ss:$16 sps:$4 sm:$0xff]  }
 0xa37   : > { %v1860_v23 = vmul.f32 1.442695, %v1857_v10  ;;  %v3681_v10 = vld [vmem:[%s4173_s9 + $0x88] ss:$16 sps:$4 sm:$0xff]  }
 0xa38   : > { %v1923_v24 = vpop.permute.xlu1 %1922 }
 0xa39   : > { %3766 = vpow2.f32 %v1860_v23  ;;  %v1928_v58 = vsel %vm1029_vm2, %v1923_v24, 0  ;;  %v3683_v23 = vld [vmem:[%s4173_s9 + $0x8c] ss:$16 sps:$4 sm:$0xff]   ;;  %v3686_v24 = vld [vmem:[%s4173_s9 + $0x64] ss:$16 sps:$4 sm:$0xff]  }
 0xa3a   : > { %3527 = vmatpush3.bf16.msra.mxu0 %v1928_v58  ;;  %3768 = vrcp.f32 %v1864_v28  ;;  %v3689_v58 = vld [vmem:[%s4173_s9 + $0x6c] ss:$16 sps:$4 sm:$0xff]   ;;  %v3692_v28 = vld [vmem:[%s4173_s9 + $0x44] ss:$16 sps:$4 sm:$0xff]  }
 0xa3b   : > { %2300 = vmatprep.subr.bf16.mxu0 %v3662_v6  ;;  %v3710_v6 = vld [vmem:[%s4185_s13 + $0x38] sm:$0xff]  }
 0xa46   : > { %v3767_v42 = vpop.eup %3766 }
 0xa47   : > { %v1865_v27 = vsel %vm1001_vm3, %v3767_v42, 0.0  ;;  %v3769_v29 = vpop.eup %3768 }
 0xa48   : > { %1866 = vadd.xlane.f32.xlu0 %v1865_v27  ;;  %v1870_v30 = vmul.f32 %v3769_v29, %v3765_v9  ;;  %v3687_v27 = vld [vmem:[%s4173_s9 + $0x68] ss:$16 sps:$4 sm:$0xff]   ;;  %v3695_v29 = vld [vmem:[%s4173_s9 + $0x4c] ss:$16 sps:$4 sm:$0xff]  }
 0xa4a   : > { %v1872_v35 = vpack.c.bf16 %v1870_v30, %v1870_v30  ;;  %v3693_v30 = vld [vmem:[%s4173_s9 + $0x48] ss:$16 sps:$4 sm:$0xff]  }
 0xa5e   : > { %1874 = vrot.lane.b32.xlu0 %v4289_v60, %s3960_s14 }
 0xad1   : > { %v1867_v61 = vpop.xlane.xlu0 %1866 }
 0xad2   : > { %3770 = vrcp.f32 %v1867_v61  ;;  %v3690_v61 = vld [vmem:[%s4173_s9 + $0x40] ss:$16 sps:$4 sm:$0xff]  }
 0xad5   : > { %v1875_v31 = vpop.permute.xlu0 %1874 }
 0xad6   : > { %v1880_v34 = vsel %vm1029_vm2, %v1875_v31, 0  ;;  %v3698_v31 = vld [vmem:[%s4173_s9 + $0x24] ss:$16 sps:$4 sm:$0xff]  }
 0xad7   : > { %3521 = vmatpush3.bf16.msra.mxu1 %v1880_v34  ;;  %v3701_v34 = vld [vmem:[%s4173_s9 + $0x2c] ss:$16 sps:$4 sm:$0xff]  }
 0xad8   : > { %3532 = vmatprep.subr.bf16.mxu1 %v3956_v5 }
 0xada   : > { %3523 = vmatmul.mubr.msk.bf16.vlgmr.msra.gmra.mxu1 %vm1001_vm3, %v1872_v35  ;;  %v3696_v35 = vld [vmem:[%s4173_s9 + $0x20] ss:$16 sps:$4 sm:$0xff]  }
 0xadb   : > { %3536 = vmatprep.mubr.msk.bf16.mxu1 %vm3957_vm0, %v3956_v5  ;;  %3533 = vmatpush3.bf16.msra.mxu1 %v3658_v39  ;;  %v3702_v39 = vld [vmem:[%s4173_s9] ss:$16 sps:$4 sm:$0xff]  }
 0xadc   : > { %3534 = vmatprep.subr.bf16.mxu1 %v3956_v5 }
 0xadf   : > { %v3771_v60 = vpop.eup %3770  ;;  %3535 = vmatpush3.bf16.msra.mxu1 %v3659_v40  ;;  %v3705_v40 = vld [vmem:[%s4173_s9 + $0x8] ss:$16 sps:$4 sm:$0xff]  }
 0xae0   : > { %v1871_v36 = vmul.f32 %v3771_v60, %v3767_v42  ;;  %2343 = vmatprep.subr.bf16.mxu1 %v3665_v8  ;;  %v3684_v42 = vld [vmem:[%s4173_s9 + $0x60] ss:$16 sps:$4 sm:$0xff]   ;;  %v3699_v60 = vld [vmem:[%s4173_s9 + $0x28] ss:$16 sps:$4 sm:$0xff]  }
 0xae1   : > { %v3712_v8 = vld [vmem:[%s4185_s13 + $0x70] sm:$0xff]  }
 0xae2   : > { %v1873_v38 = vpack.c.bf16 %v1871_v36, %v1871_v36  ;;  %v3704_v36 = vld [vmem:[%s4173_s9 + $0x4] ss:$16 sps:$4 sm:$0xff]  }
 0xae4   : > { %3529 = vmatmul.mubr.msk.bf16.vlgmr.msra.gmra.mxu0 %vm1001_vm3, %v1873_v38  ;;  %v3707_v38 = vld [vmem:[%s4173_s9 + $0xc] ss:$16 sps:$4 sm:$0xff]  }
 0xae5   : > { %2332 = vmatprep.mubr.bf16.mxu0 %v3955_v4  ;;  %2301 = vmatpush1.bf16.msra.mxu0 %v3660_v3  ;;  %v3709_v3 = vld [vmem:[%s4185_s13 + $0xf8] sm:$0xff]  }
 0xae6   : > { %2302 = vmatprep.subr.bf16.mxu0 %v3668_v14  ;;  %v3721_v14 = vld [vmem:[%s4185_s13 + $0xe0] sm:$0xff]  }
 0xb9a   : > { %v1916_v49 = vpop.f32.mrf.mxu1 }
 0xb9c   : > { %v3524_v41 = vpop.f32.mrf.mxu1 }
 0xb9e   : > { %v1919_v43 = vpop.f32.mrf.mxu1 }
 0xba0   : > { %v3525_v44 = vpop.f32.mrf.mxu1 }
 0xba4   : > { %v1964_v45 = vpop.f32.mrf.mxu0 }
 0xba5   : > { %v1970_v46 = vpack.c.bf16 %v1964_v45, %v1916_v49 }
 0xba6   : > { %v3530_v48 = vpop.f32.mrf.mxu0 }
 0xba7   : > { %3537 = vmatmul.mubr.msk.bf16.vlgmr.msra.gmra.mxu1 %vm908_vm1, %v1970_v46 }
 0xba8   : > { %v1967_v50 = vpop.f32.mrf.mxu0  ;;  %2375 = vmatprep.mubr.bf16.mxu1 %v3955_v4  ;;  %2344 = vmatpush1.bf16.msra.mxu1 %v3663_v7  ;;  %v3711_v7 = vld [vmem:[%s4185_s13 + $0xb8] sm:$0xff]  }
 0xba9   : > { %2345 = vmatprep.subr.bf16.mxu1 %v3671_v15  ;;  %v3722_v15 = vld [vmem:[%s4185_s13 + $0x20] sm:$0xff]  }
 0xbaa   : > { %v3531_v53 = vpop.f32.mrf.mxu0 }
 0xbab   : > { %v3221_v53 = vld [vmem:[%s4780_s12] ss:$0 sm:$0xff] }
 0xbac   : > { %2346 = vmatpush1.bf16.msra.mxu1 %v3669_v17  ;;  %v3724_v17 = vld [vmem:[%s4185_s13 + $0x58] sm:$0xff]  }
 0xbad   : > { %2347 = vmatprep.subr.bf16.mxu1 %v3677_v19  ;;  %v3726_v19 = vld [vmem:[%s4185_s13 + $0x18] sm:$0xff]  }
 0xbb0   : > { %2348 = vmatpush1.bf16.msra.mxu1 %v3675_v21  ;;  %v3728_v21 = vld [vmem:[%s4185_s13 + $0x50] sm:$0xff]  }
 0xbb1   : > { %2349 = vmatprep.subr.bf16.mxu1 %v3683_v23  ;;  %v3732_v23 = vld [vmem:[%s4185_s13 + $0x48] sm:$0xff]  }
 0xbb4   : > { %2350 = vmatpush1.bf16.msra.mxu1 %v3681_v10  ;;  %v3731_v10 = vld [vmem:[%s4185_s13 + $0x90] sm:$0xff]  }
 0xbb5   : > { %2351 = vmatprep.subr.bf16.mxu1 %v3689_v58  ;;  %v3734_v58 = vld [vmem:[%s4185_s13 + $0x8] sm:$0xff]  }
 0xbb8   : > { %2352 = vmatpush1.bf16.msra.mxu1 %v3687_v27  ;;  %v3736_v27 = vld [vmem:[%s4185_s13 + $0x40] sm:$0xff]  }
 0xbb9   : > { %2353 = vmatprep.subr.bf16.mxu1 %v3695_v29  ;;  %v3738_v29 = vld [vmem:[%s4185_s13] sm:$0xff]  }
 0xbbc   : > { %2354 = vmatpush1.bf16.msra.mxu1 %v3693_v30  ;;  %v2118_v30 = vld [vmem:[%s4179_s27] sm:$0xf] }
 0xbbd   : > { %2355 = vmatprep.subr.bf16.mxu1 %v3701_v34  ;;  %v2123_v34 = vrot.slane %v2118_v30, %v677_v37 }
 0xbc0   : > { %2356 = vmatpush1.bf16.msra.mxu1 %v3699_v60 }
 0xbc1   : > { %2357 = vmatprep.subr.bf16.mxu1 %v3707_v38  ;;  %v2127_v38 = vrot.slane %v2118_v30, %v681_v33 }
 0xbc4   : > { %2358 = vmatpush1.bf16.msra.mxu1 %v3705_v40 }
 0xbc5   : > { %3370 = vmatprep.subr.bf16.mxu1 %v3709_v3 }
 0xc67   : > { %v2024_v5 = vpop.f32.mrf.mxu1 }
 0xc68   : > { %v2031_v54 = vadd.f32 %v2024_v5, %v1748_v13 }
 0xc69   : > { %v3538_v56 = vpop.f32.mrf.mxu1 }
 0xc6a   : > { %v2033_v59 = vadd.f32 %v2031_v54, %v4229_v25 }
 0xc6b   : > { %v2027_v62 = vpop.f32.mrf.mxu1 }
 0xc6c   : > { %v2032_v63 = vadd.f32 %v2027_v62, %v1749_v16  ;;  %v4466_v0 = vadd.f32 %v3220_v57, %v2033_v59  ;;  %v3666_v16 = vld [vmem:[%s4173_s9 + $0xc0] ss:$16 sps:$4 sm:$0xff]  }
 0xc6d   : > { %v3539_v1 = vpop.f32.mrf.mxu1  ;;  %2303 = vmatpush1.bf16.msra.mxu0 %v3666_v16  ;;  %v3723_v16 = vld [vmem:[%s4185_s13 + $0xa0] sm:$0xff]  }
 0xc6e   : > { %v2034_v4 = vadd.f32 %v2032_v63, %v4234_v26  ;;  %2046 = vadd.xlane.f32.xlu1 %v4466_v0  ;;  %2304 = vmatprep.subr.bf16.mxu0 %v3674_v18  ;;  %v3725_v18 = vld [vmem:[%s4185_s13 + $0xd8] sm:$0xff]  }
 0xc70   : > { %v4470_v2 = vadd.f32 %v3220_v57, %v2034_v4  ;;  %v3222_v57 = vld [vmem:[%s4781_s23] ss:$0 sm:$0xff]  ;;  %v3708_v4 = vld [vmem:[%s4185_s13 + $0x78] sm:$0xff]  }
 0xc71   : > { %2305 = vmatpush1.bf16.msra.mxu0 %v3672_v20  ;;  %v3727_v20 = vld [vmem:[%s4185_s13 + $0x98] sm:$0xff]  }
 0xc72   : > { %2048 = vadd.xlane.f32.xlu0 %v4470_v2  ;;  %2306 = vmatprep.subr.bf16.mxu0 %v3680_v22  ;;  %v3729_v22 = vld [vmem:[%s4185_s13 + $0xd0] sm:$0xff]  }
 0xc75   : > { %2307 = vmatpush1.bf16.msra.mxu0 %v3678_v55  ;;  %v3730_v55 = vld [vmem:[%s4185_s13 + $0x10] sm:$0xff]  }
 0xc76   : > { %2308 = vmatprep.subr.bf16.mxu0 %v3686_v24  ;;  %v3733_v24 = vld [vmem:[%s4185_s13 + $0xc8] sm:$0xff]  }
 0xc79   : > { %2309 = vmatpush1.bf16.msra.mxu0 %v3684_v42  ;;  %v3735_v42 = vld [vmem:[%s4185_s13 + $0x88] sm:$0xff]  }
 0xc7a   : > { %2310 = vmatprep.subr.bf16.mxu0 %v3692_v28  ;;  %v3737_v28 = vld [vmem:[%s4185_s13 + $0xc0] sm:$0xff]  }
 0xc7d   : > { %2311 = vmatpush1.bf16.msra.mxu0 %v3690_v61  ;;  %v3739_v61 = vld [vmem:[%s4185_s13 + $0x80] sm:$0xff]  }
 0xc7e   : > { %2312 = vmatprep.subr.bf16.mxu0 %v3698_v31  ;;  %v2134_v31 = vsub.s32 3, %v4253_v32 }
 0xc81   : > { %2313 = vmatpush1.bf16.msra.mxu0 %v3696_v35  ;;  %v2131_v35 = vrot.slane %v2118_v30, %v685_v52 }
 0xc82   : > { %2314 = vmatprep.subr.bf16.mxu0 %v3704_v36 }
 0xc85   : > { %2315 = vmatpush1.bf16.msra.mxu0 %v3702_v39  ;;  %v2135_v39 = vrot.slane %v2118_v30, %v2134_v31 }
 0xc86   : > { %3348 = vmatprep.subr.bf16.mxu0 %v3708_v4 }
 0xcf7   : > { %v2047_v25 = vpop.xlane.xlu1 %2046 }
 0xcf8   : > { %v2051_v26 = vmul.f32 0.0078125, %v2047_v25  ;;  %v3713_v25 = vld [vmem:[%s4185_s13 + $0xf0] sm:$0xff]  }
 0xcfa   : > { %v4478_v9 = vsub.f32 %v4466_v0, %v2051_v26  ;;  %v3714_v26 = vld [vmem:[%s4185_s13 + $0x30] sm:$0xff]  }
 0xcfb   : > { %v2049_v11 = vpop.xlane.xlu0 %2048 }
 0xcfc   : > { %v2052_v12 = vmul.f32 0.0078125, %v2049_v11  ;;  %v2055_v47 = vmul.f32 %v4478_v9, %v4478_v9  ;;  %v3716_v11 = vld [vmem:[%s4185_s13 + $0x68] sm:$0xff]  }
 0xcfe   : > { %v4483_v13 = vsub.f32 %v4470_v2, %v2052_v12  ;;  %2057 = vadd.xlane.f32.xlu0 %v2055_v47  ;;  %v3717_v12 = vld [vmem:[%s4185_s13 + $0xe8] sm:$0xff]  }
 0xcff   : > { %v3718_v47 = vld [vmem:[%s4185_s13 + $0x28] sm:$0xff]  }
 0xd00   : > { %v2056_v51 = vmul.f32 %v4483_v13, %v4483_v13 }
 0xd02   : > { %2059 = vadd.xlane.f32.xlu1 %v2056_v51  ;;  %v3720_v51 = vld [vmem:[%s4185_s13 + $0x60] sm:$0xff]  }
 0xd87   : > { %v2058_v49 = vpop.xlane.xlu0 %2057 }
 0xd88   : > { %v2061_v41 = vmul.f32 0.0078125, %v2058_v49 }
 0xd8a   : > { %v2063_v43 = vadd.f32 1e-05, %v2061_v41 }
 0xd8b   : > { %v2060_v44 = vpop.xlane.xlu1 %2059 }
 0xd8c   : > { %3772 = vrsqrt.f32 %v2063_v43  ;;  %v2062_v45 = vmul.f32 0.0078125, %v2060_v44 }
 0xd8e   : > { %v2064_v46 = vadd.f32 1e-05, %v2062_v45 }
 0xd90   : > { %3774 = vrsqrt.f32 %v2064_v46 }
 0xd99   : > { %v3773_v48 = vpop.eup %3772 }
 0xd9a   : > { %v2067_v50 = vmul.f32 %v3773_v48, %v4478_v9  ;;  %v3715_v9 = vld [vmem:[%s4185_s13 + $0xb0] sm:$0xff]  }
 0xd9c   : > { %v2075_v56 = vmul.f32 %v3221_v53, %v2067_v50 }
 0xd9d   : > { %v3775_v5 = vpop.eup %3774 }
 0xd9e   : > { %v2068_v54 = vmul.f32 %v3775_v5, %v4483_v13  ;;  %v2083_v62 = vadd.f32 %v3222_v57, %v2075_v56  ;;  %v3719_v13 = vld [vmem:[%s4185_s13 + $0xa8] sm:$0xff]  }
 0xda0   : > { %v2076_v59 = vmul.f32 %v3221_v53, %v2068_v54 }
 0xda2   : > { %v2084_v63 = vadd.f32 %v3222_v57, %v2076_v59 }
 0xda4   : > { %v2085_v1 = vpack.c.bf16 %v2084_v63, %v2083_v62 }
 0xda6   : > { %2333 = vmatmul.mubr.bf16.vlgmr.msra.gmra.mxu0 %v2085_v1  ;;  %2376 = vmatmul.mubr.bf16.vlgmr.msra.gmra.mxu1 %v2085_v1 }
 0xda7   : > { %3349 = vmatpush3.bf16.msra.mxu0 %v3710_v6  ;;  %3371 = vmatpush3.bf16.msra.mxu1 %v3711_v7 }
 0xda8   : > { %3350 = vmatprep.subr.bf16.mxu0 %v3712_v8  ;;  %3372 = vmatprep.subr.bf16.mxu1 %v3713_v25 }
 0xdab   : > { %3351 = vmatpush3.bf16.msra.mxu0 %v3714_v26  ;;  %3373 = vmatpush3.bf16.msra.mxu1 %v3715_v9 }
 0xdac   : > { %3352 = vmatprep.subr.bf16.mxu0 %v3716_v11  ;;  %3374 = vmatprep.subr.bf16.mxu1 %v3717_v12 }
 0xdaf   : > { %3353 = vmatpush3.bf16.msra.mxu0 %v3718_v47  ;;  %3375 = vmatpush3.bf16.msra.mxu1 %v3719_v13 }
 0xdb0   : > { %3354 = vmatprep.subr.bf16.mxu0 %v3720_v51  ;;  %3376 = vmatprep.subr.bf16.mxu1 %v3721_v14 }
 0xdb3   : > { %3355 = vmatpush3.bf16.msra.mxu0 %v3722_v15  ;;  %3377 = vmatpush3.bf16.msra.mxu1 %v3723_v16 }
 0xdb4   : > { %3356 = vmatprep.subr.bf16.mxu0 %v3724_v17  ;;  %3378 = vmatprep.subr.bf16.mxu1 %v3725_v18 }
 0xdb7   : > { %3357 = vmatpush3.bf16.msra.mxu0 %v3726_v19  ;;  %3379 = vmatpush3.bf16.msra.mxu1 %v3727_v20 }
 0xdb8   : > { %3358 = vmatprep.subr.bf16.mxu0 %v3728_v21  ;;  %3380 = vmatprep.subr.bf16.mxu1 %v3729_v22 }
 0xdbb   : > { %3359 = vmatpush3.bf16.msra.mxu0 %v3730_v55  ;;  %3381 = vmatpush3.bf16.msra.mxu1 %v3731_v10 }
 0xdbc   : > { %3360 = vmatprep.subr.bf16.mxu0 %v3732_v23  ;;  %3382 = vmatprep.subr.bf16.mxu1 %v3733_v24 }
 0xdbf   : > { %3361 = vmatpush3.bf16.msra.mxu0 %v3734_v58  ;;  %3383 = vmatpush3.bf16.msra.mxu1 %v3735_v42 }
 0xdc0   : > { %3362 = vmatprep.subr.bf16.mxu0 %v3736_v27  ;;  %3384 = vmatprep.subr.bf16.mxu1 %v3737_v28 }
 0xdc3   : > { %3363 = vmatpush3.bf16.msra.mxu0 %v3738_v29  ;;  %3385 = vmatpush3.bf16.msra.mxu1 %v3739_v61 }
 0xe66   : > { %v2334_v60 = vpop.f32.mrf.mxu0  ;;  %v2377_v36 = vpop.f32.mrf.mxu1 }
 0xe67   : > { %v4567_v40 = vadd.f32 %v2334_v60, %v2123_v34  ;;  %v4569_v49 = vadd.f32 %v2377_v36, %v2131_v35 }
 0xe68   : > { %v2336_v41 = vpop.f32.mrf.mxu0  ;;  %v2379_v43 = vpop.f32.mrf.mxu1 }
 0xe69   : > { %v4572_v44 = vmul.f32 0.70710677, %v4567_v40  ;;  %v4575_v37 = vmul.f32 0.70710677, %v4569_v49  ;;  %v4577_v45 = vadd.f32 %v2336_v41, %v2127_v38  ;;  %v4579_v52 = vadd.f32 %v2379_v43, %v2135_v39 }
 0xe6a   : > { %v2338_v48 = vpop.f32.mrf.mxu0  ;;  %v2381_v62 = vpop.f32.mrf.mxu1 }
 0xe6b   : > { %v2418_v32 = vand.u32 2147483647, %v4572_v44  ;;  %v4583_v33 = vand.u32 2147483647, %v4575_v37  ;;  %v4586_v46 = vmul.f32 0.70710677, %v4577_v45  ;;  %v4594_v3 = vadd.f32 %v2338_v48, %v2123_v34 }
 0xe6c   : > { %v4591_v54 = vmul.f32 0.70710677, %v4579_v52  ;;  %v2340_v63 = vpop.f32.mrf.mxu0  ;;  %v4596_v6 = vadd.f32 %v2381_v62, %v2131_v35  ;;  %v2383_v47 = vpop.f32.mrf.mxu1  ;;  %vm2402_vm4 = vcmp.ge.f32.partialorder %v4572_v44, 0.0  ;;  %vm2404_vm6 = vcmp.ge.f32.partialorder %v4575_v37, 0.0 }
 0xe6d   : > { %v2426_v50 = vmul.f32 0.3275911, %v2418_v32  ;;  %v2428_v53 = vmul.f32 0.3275911, %v4583_v33  ;;  %v2419_v5 = vand.u32 2147483647, %v4586_v46  ;;  %v4598_v7 = vadd.f32 %v2340_v63, %v2127_v38 }
 0xe6e   : > { %v2421_v4 = vand.u32 2147483647, %v4591_v54  ;;  %v4601_v25 = vmul.f32 0.70710677, %v4594_v3  ;;  %v4604_v9 = vmul.f32 0.70710677, %v4596_v6  ;;  %v4612_v15 = vadd.f32 %v2383_v47, %v2135_v39 }
 0xe6f   : > { %v2434_v56 = vadd.f32 1.0, %v2426_v50  ;;  %v2436_v57 = vadd.f32 1.0, %v2428_v53  ;;  %v2427_v59 = vmul.f32 0.3275911, %v2419_v5  ;;  %v4608_v12 = vmul.f32 0.70710677, %v4598_v7 }
 0xe70   : > { %v2429_v8 = vmul.f32 0.3275911, %v2421_v4  ;;  %v2422_v11 = vand.u32 2147483647, %v4601_v25  ;;  %v2424_v51 = vand.u32 2147483647, %v4604_v9 }
 0xe71   : > { %3776 = vrcp.f32 %v2434_v56  ;;  %v2435_v1 = vadd.f32 1.0, %v2427_v59  ;;  %v2423_v14 = vand.u32 2147483647, %v4608_v12  ;;  %v2522_v21 = vsub.f32 0.0, %v2418_v32 }
 0xe72   : > { %3778 = vrcp.f32 %v2436_v57  ;;  %v2437_v26 = vadd.f32 1.0, %v2429_v8  ;;  %v2430_v13 = vmul.f32 0.3275911, %v2422_v11  ;;  %v2432_v17 = vmul.f32 0.3275911, %v2424_v51 }
 0xe73   : > { %3780 = vrcp.f32 %v2435_v1  ;;  %v2431_v18 = vmul.f32 0.3275911, %v2423_v14  ;;  %v4617_v55 = vmul.f32 0.70710677, %v4612_v15  ;;  %v2523_v58 = vsub.f32 0.0, %v2419_v5 }
 0xe74   : > { %3782 = vrcp.f32 %v2437_v26  ;;  %v2438_v16 = vadd.f32 1.0, %v2430_v13  ;;  %v2440_v19 = vadd.f32 1.0, %v2432_v17  ;;  %v2526_v27 = vsub.f32 0.0, %v2422_v11 }
 0xe75   : > { %v2439_v22 = vadd.f32 1.0, %v2431_v18  ;;  %v4624_v28 = vand.u32 2147483647, %v4617_v55  ;;  %v2530_v61 = vmul.f32 %v2522_v21, %v2418_v32  ;;  %v2524_v36 = vsub.f32 0.0, %v4583_v33 }
 0xe76   : > { %3784 = vrcp.f32 %v2438_v16  ;;  %v2531_v38 = vmul.f32 %v2523_v58, %v2419_v5  ;;  %v2525_v39 = vsub.f32 0.0, %v2421_v4  ;;  %v2534_v50 = vmul.f32 %v2526_v27, %v2422_v11 }
 0xe77   : > { %3786 = vrcp.f32 %v2440_v19  ;;  %v2433_v35 = vmul.f32 0.3275911, %v4624_v28  ;;  %v2538_v53 = vmul.f32 1.442695, %v2530_v61  ;;  %v2528_v57 = vsub.f32 0.0, %v2424_v51 }
 0xe78   : > { %3788 = vrcp.f32 %v2439_v22  ;;  %v2527_v59 = vsub.f32 0.0, %v2423_v14  ;;  %v2532_v5 = vmul.f32 %v2524_v36, %v4583_v33  ;;  %v2540_v8 = vmul.f32 1.442695, %v2531_v38 }
 0xe79   : > { %v2441_v32 = vadd.f32 1.0, %v2433_v35  ;;  %v2533_v47 = vmul.f32 %v2525_v39, %v2421_v4  ;;  %v2546_v16 = vmul.f32 1.442695, %v2534_v50  ;;  %v2536_v18 = vmul.f32 %v2528_v57, %v2424_v51 }
 0xe7a   : > { %v2535_v19 = vmul.f32 %v2527_v59, %v2423_v14  ;;  %v2542_v33 = vmul.f32 1.442695, %v2532_v5  ;;  %vm2403_vm5 = vcmp.ge.f32.partialorder %v4586_v46, 0.0  ;;  %vm2406_vm7 = vcmp.ge.f32.partialorder %v4601_v25, 0.0 }
 0xe7b   : > { %3790 = vrcp.f32 %v2441_v32  ;;  %v2544_v4 = vmul.f32 1.442695, %v2533_v47  ;;  %vm2405_vm8 = vcmp.ge.f32.partialorder %v4591_v54, 0.0  ;;  %vm2408_vm9 = vcmp.ge.f32.partialorder %v4604_v9, 0.0 }
 0xe7c   : > { %3792 = vpow2.f32 %v2538_v53  ;;  %vm2407_vm10 = vcmp.ge.f32.partialorder %v4608_v12, 0.0  ;;  %vm2409_vm11 = vcmp.ge.f32.partialorder %v4617_v55, 0.0  ;;  %v2392_v55 = vmul.f32 0.5, %v4596_v6 }
 0xe7d   : > { %3794 = vpow2.f32 %v2540_v8 }
 0xe7e   : > { %v4614_v20 = vpop.eup %3776  ;;  %3796 = vpow2.f32 %v2546_v16 }
 0xe7f   : > { %v4619_v10 = vpop.eup %3778  ;;  %v2450_v23 = vmul.f32 1.0614054, %v4614_v20  ;;  %3798 = vpow2.f32 %v2542_v33 }
 0xe80   : > { %v2452_v24 = vmul.f32 1.0614054, %v4619_v10  ;;  %v4626_v29 = vpop.eup %3780  ;;  %3800 = vpow2.f32 %v2544_v4 }
 0xe81   : > { %v2458_v42 = vadd.f32 -1.4531521, %v2450_v23  ;;  %v2451_v34 = vmul.f32 1.0614054, %v4626_v29  ;;  %v4633_v41 = vpop.eup %3782 }
 0xe82   : > { %v2460_v30 = vadd.f32 -1.4531521, %v2452_v24  ;;  %v2453_v56 = vmul.f32 1.0614054, %v4633_v41 }
 0xe83   : > { %v2466_v31 = vmul.f32 %v4614_v20, %v2458_v42  ;;  %v2459_v48 = vadd.f32 -1.4531521, %v2451_v34  ;;  %v4639_v11 = vpop.eup %3784  ;;  %v2548_v34 = vmul.f32 1.442695, %v2535_v19 }
 0xe84   : > { %v2468_v60 = vmul.f32 %v4619_v10, %v2460_v30  ;;  %v2461_v26 = vadd.f32 -1.4531521, %v2453_v56  ;;  %v2454_v24 = vmul.f32 1.0614054, %v4639_v11  ;;  %v4645_v42 = vpop.eup %3786  ;;  %v2529_v30 = vsub.f32 0.0, %v4624_v28 }
 0xe85   : > { %v2474_v43 = vadd.f32 1.4214138, %v2466_v31  ;;  %v2467_v1 = vmul.f32 %v4626_v29, %v2459_v48  ;;  %v2456_v14 = vmul.f32 1.0614054, %v4645_v42  ;;  %v2550_v31 = vmul.f32 1.442695, %v2536_v18  ;;  %v4650_v35 = vpop.eup %3788 }
 0xe86   : > { %v2476_v63 = vadd.f32 1.4214138, %v2468_v60  ;;  %v2469_v17 = vmul.f32 %v4633_v41, %v2461_v26  ;;  %v2462_v61 = vadd.f32 -1.4531521, %v2454_v24  ;;  %v2455_v50 = vmul.f32 1.0614054, %v4650_v35 }
 0xe87   : > { %v2482_v62 = vmul.f32 %v4614_v20, %v2474_v43  ;;  %v2475_v13 = vadd.f32 1.4214138, %v2467_v1  ;;  %v2464_v48 = vadd.f32 -1.4531521, %v2456_v14  ;;  %v2537_v53 = vmul.f32 %v2529_v30, %v4624_v28 }
 0xe88   : > { %v2484_v22 = vmul.f32 %v4619_v10, %v2476_v63  ;;  %v2477_v58 = vadd.f32 1.4214138, %v2469_v17  ;;  %v2470_v39 = vmul.f32 %v4639_v11, %v2462_v61  ;;  %3802 = vpow2.f32 %v2550_v31  ;;  %v4660_v5 = vpop.eup %3790 }
 0xe89   : > { %v2490_v21 = vadd.f32 -0.28449672, %v2482_v62  ;;  %v2483_v23 = vmul.f32 %v4626_v29, %v2475_v13  ;;  %v2472_v57 = vmul.f32 %v4645_v42, %v2464_v48  ;;  %v2463_v59 = vadd.f32 -1.4531521, %v2455_v50 }
 0xe8a   : > { %v2485_v51 = vmul.f32 %v4633_v41, %v2477_v58  ;;  %v2492_v36 = vadd.f32 -0.28449672, %v2484_v22  ;;  %v2478_v32 = vadd.f32 1.4214138, %v2470_v39  ;;  %3804 = vpow2.f32 %v2548_v34 }
 0xe8b   : > { %v2491_v27 = vadd.f32 -0.28449672, %v2483_v23  ;;  %v2498_v60 = vmul.f32 %v4614_v20, %v2490_v21  ;;  %v2480_v26 = vadd.f32 1.4214138, %v2472_v57  ;;  %v2471_v47 = vmul.f32 %v4650_v35, %v2463_v59  ;;  %v3793_v21 = vpop.eup %3792 }
 0xe8c   : > { %v2493_v43 = vadd.f32 -0.28449672, %v2485_v51  ;;  %v2486_v1 = vmul.f32 %v4639_v11, %v2478_v32  ;;  %v2500_v8 = vmul.f32 %v4619_v10, %v2492_v36  ;;  %v2457_v28 = vmul.f32 1.0614054, %v4660_v5  ;;  %v3795_v61 = vpop.eup %3794 }
 0xe8d   : > { %v2499_v38 = vmul.f32 %v4626_v29, %v2491_v27  ;;  %v2506_v62 = vadd.f32 0.2548296, %v2498_v60  ;;  %v2552_v16 = vmul.f32 1.442695, %v2537_v53  ;;  %v2488_v18 = vmul.f32 %v4645_v42, %v2480_v26  ;;  %v3797_v51 = vpop.eup %3796 }
 0xe8e   : > { %v2501_v63 = vmul.f32 %v4633_v41, %v2493_v43  ;;  %v2494_v13 = vadd.f32 -0.28449672, %v2486_v1  ;;  %v2479_v19 = vadd.f32 1.4214138, %v2471_v47  ;;  %v2465_v33 = vadd.f32 -1.4531521, %v2457_v28  ;;  %v3799_v50 = vpop.eup %3798 }
 0xe8f   : > { %v2507_v56 = vadd.f32 0.2548296, %v2499_v38  ;;  %v2514_v22 = vmul.f32 %v4614_v20, %v2506_v62  ;;  %v2508_v58 = vadd.f32 0.2548296, %v2500_v8  ;;  %v2496_v4 = vadd.f32 -0.28449672, %v2488_v18  ;;  %v3801_v57 = vpop.eup %3800 }
 0xe90   : > { %v2509_v23 = vadd.f32 0.2548296, %v2501_v63  ;;  %v2502_v24 = vmul.f32 %v4639_v11, %v2494_v13  ;;  %v2487_v27 = vmul.f32 %v4650_v35, %v2479_v19  ;;  %3806 = vpow2.f32 %v2552_v16 }
 0xe91   : > { %v2515_v17 = vmul.f32 %v4626_v29, %v2507_v56  ;;  %v2473_v29 = vmul.f32 %v4660_v5, %v2465_v33  ;;  %v2504_v20 = vmul.f32 %v4645_v42, %v2496_v4  ;;  %v2554_v34 = vmul.f32 %v3793_v21, %v2514_v22 }
 0xe92   : > { %v2510_v30 = vadd.f32 0.2548296, %v2502_v24  ;;  %v2495_v31 = vadd.f32 -0.28449672, %v2487_v27  ;;  %v2517_v60 = vmul.f32 %v4633_v41, %v2509_v23  ;;  %v2516_v39 = vmul.f32 %v4619_v10, %v2508_v58 }
 0xe93   : > { %v2555_v14 = vmul.f32 %v3795_v61, %v2515_v17  ;;  %v2481_v38 = vadd.f32 1.4214138, %v2473_v29  ;;  %v2512_v43 = vadd.f32 0.2548296, %v2504_v20  ;;  %v3961_v32 = vmov -1.0  }
 0xe94   : > { %v2518_v36 = vmul.f32 %v4639_v11, %v2510_v30  ;;  %v2503_v48 = vmul.f32 %v4650_v35, %v2495_v31  ;;  %v2410_v53 = vsel %vm2402_vm4, 1.0, %v3961_v32  ;;  %v2411_v11 = vsel %vm2403_vm5, 1.0, %v3961_v32 }
 0xe95   : > { %v2489_v41 = vmul.f32 %v4660_v5, %v2481_v38  ;;  %v2563_v59 = vsub.f32 1.0, %v2555_v14  ;;  %v2520_v10 = vmul.f32 %v4645_v42, %v2512_v43  ;;  %v3803_v63 = vpop.eup %3802  ;;  %v2562_v1 = vsub.f32 1.0, %v2554_v34 }
 0xe96   : > { %v2558_v56 = vmul.f32 %v3797_v51, %v2518_v36  ;;  %v2511_v62 = vadd.f32 0.2548296, %v2503_v48  ;;  %v2557_v8 = vmul.f32 %v3801_v57, %v2517_v60  ;;  %v2556_v44 = vmul.f32 %v3799_v50, %v2516_v39 }
 0xe97   : > { %v2497_v47 = vadd.f32 -0.28449672, %v2489_v41  ;;  %v2414_v13 = vsel %vm2406_vm7, 1.0, %v3961_v32  ;;  %v2560_v28 = vmul.f32 %v3803_v63, %v2520_v10  ;;  %v3805_v16 = vpop.eup %3804  ;;  %v2571_v42 = vmul.f32 %v2563_v59, %v2411_v11 }
 0xe98   : > { %v2566_v26 = vsub.f32 1.0, %v2558_v56  ;;  %v2519_v25 = vmul.f32 %v4650_v35, %v2511_v62  ;;  %v2570_v21 = vmul.f32 %v2562_v1, %v2410_v53  ;;  %v2565_v22 = vsub.f32 1.0, %v2557_v8 }
 0xe99   : > { %v2505_v46 = vmul.f32 %v4660_v5, %v2497_v47  ;;  %v2568_v18 = vsub.f32 1.0, %v2560_v28  ;;  %v2412_v24 = vsel %vm2404_vm6, 1.0, %v3961_v32  ;;  %v2564_v35 = vsub.f32 1.0, %v2556_v44 }
 0xe9a   : > { %v2574_v17 = vmul.f32 %v2566_v26, %v2414_v13  ;;  %v2559_v19 = vmul.f32 %v3805_v16, %v2519_v25  ;;  %v2413_v33 = vsel %vm2405_vm8, 1.0, %v3961_v32  ;;  %v2416_v4 = vsel %vm2408_vm9, 1.0, %v3961_v32 }
 0xe9b   : > { %v2513_v23 = vadd.f32 0.2548296, %v2505_v46  ;;  %v2415_v27 = vsel %vm2407_vm10, 1.0, %v3961_v32  ;;  %v2579_v30 = vadd.f32 1.0, %v2571_v42  ;;  %v2390_v29 = vmul.f32 0.5, %v4594_v3 }
 0xe9c   : > { %v2567_v58 = vsub.f32 1.0, %v2559_v19  ;;  %v2582_v54 = vadd.f32 1.0, %v2574_v17  ;;  %v2576_v12 = vmul.f32 %v2568_v18, %v2416_v4  ;;  %v2578_v14 = vadd.f32 1.0, %v2570_v21 }
 0xe9d   : > { %v2521_v9 = vmul.f32 %v4660_v5, %v2513_v23  ;;  %v3807_v61 = vpop.eup %3806  ;;  %v2573_v20 = vmul.f32 %v2565_v22, %v2413_v33  ;;  %v2572_v31 = vmul.f32 %v2564_v35, %v2412_v24  ;;  %v2387_v34 = vmul.f32 0.5, %v4577_v45 }
 0xe9e   : > { %v2575_v51 = vmul.f32 %v2567_v58, %v2415_v27  ;;  %v2391_v60 = vmul.f32 0.5, %v4598_v7  ;;  %v2386_v38 = vmul.f32 0.5, %v4567_v40  ;;  %v2590_v5 = vmul.f32 %v2582_v54, %v2390_v29 }
 0xe9f   : > { %v2561_v37 = vmul.f32 %v3807_v61, %v2521_v9  ;;  %v2587_v43 = vmul.f32 %v2579_v30, %v2387_v34  ;;  %v2584_v48 = vadd.f32 1.0, %v2576_v12  ;;  %v2417_v50 = vsel %vm2409_vm11, 1.0, %v3961_v32 }
 0xea0   : > { %v2583_v36 = vadd.f32 1.0, %v2575_v51  ;;  %v2586_v53 = vmul.f32 %v2578_v14, %v2386_v38  ;;  %v2581_v56 = vadd.f32 1.0, %v2573_v20  ;;  %v2580_v57 = vadd.f32 1.0, %v2572_v31 }
 0xea1   : > { %v2569_v39 = vsub.f32 1.0, %v2561_v37  ;;  %v2389_v45 = vmul.f32 0.5, %v4579_v52  ;;  %v2393_v7 = vmul.f32 0.5, %v4612_v15  ;;  %v2388_v10 = vmul.f32 0.5, %v4569_v49  ;;  %v3255_v52 = vld [vmem:[%s622_s15] ss:$0 sm:$0xff] }
 0xea2   : > { %v2591_v3 = vmul.f32 %v2583_v36, %v2391_v60  ;;  %v2594_v59 = vpack.c.bf16 %v2590_v5, %v2586_v53  ;;  %v2592_v62 = vmul.f32 %v2584_v48, %v2392_v55 }
 0xea3   : > { %v2577_v41 = vmul.f32 %v2569_v39, %v2417_v50  ;;  %v2589_v63 = vmul.f32 %v2581_v56, %v2389_v45  ;;  %v2588_v1 = vmul.f32 %v2580_v57, %v2388_v10 }
 0xea4   : > { %v2595_v11 = vpack.c.bf16 %v2591_v3, %v2587_v43 }
 0xea5   : > { %v2585_v40 = vadd.f32 1.0, %v2577_v41  ;;  %v2596_v26 = vpack.c.bf16 %v2592_v62, %v2588_v1 }
 0xea6   : > { %2893 = vmatprep.mubr.bf16.mxu0 %v2595_v11 }
 0xea7   : > { %v2593_v32 = vmul.f32 %v2585_v40, %v2393_v7  ;;  %2894 = vmatmul.mubr.bf16.vlgmr.msra.gmra.mxu0 %v2594_v59 }
 0xea9   : > { %v2597_v8 = vpack.c.bf16 %v2593_v32, %v2589_v63 }
 0xeab   : > { %2934 = vmatprep.mubr.bf16.mxu1 %v2597_v8 }
 0xeac   : > { %2935 = vmatmul.mubr.bf16.vlgmr.msra.gmra.mxu1 %v2596_v26 }
 0xf67   : > { %v3364_v6 = vpop.f32.mrf.mxu0 }
 0xf69   : > { %v3365_v47 = vpop.f32.mrf.mxu0 }
 0xf6a   : > { %v3366_v15 = vadd.f32 %v3365_v47, %v3364_v6 }
 0xf6b   : > { %v3367_v44 = vpop.f32.mrf.mxu0 }
 0xf6c   : > { %v3386_v49 = vpop.f32.mrf.mxu1  ;;  %v2896_v13 = vadd.f32 %v3366_v15, %v3255_v52 }
 0xf6d   : > { %v3368_v28 = vpop.f32.mrf.mxu0 }
 0xf6e   : > { %v3387_v25 = vpop.f32.mrf.mxu1  ;;  %v3369_v16 = vadd.f32 %v3368_v28, %v3367_v44 }
 0xf6f   : > { %v3388_v17 = vadd.f32 %v3387_v25, %v3386_v49 }
 0xf70   : > { %v3389_v46 = vpop.f32.mrf.mxu1  ;;  %v2899_v18 = vadd.f32 %v3369_v16, %v3255_v52 }
 0xf71   : > { %v2937_v42 = vadd.f32 %v3388_v17, %v2896_v13 }
 0xf72   : > { %v3390_v19 = vpop.f32.mrf.mxu1 }
 0xf73   : > { %v2943_v21 = vadd.f32 %v2937_v42, %v4466_v0  ;;  %v3391_v22 = vadd.f32 %v3390_v19, %v3389_v46 }
 0xf75   : > { %2945 = vst [vmem:[%s4778_s24] sm:$0xff] %v2943_v21  ;;  %v2940_v23 = vadd.f32 %v3391_v22, %v2899_v18 }
 0xf77   : > { %v2944_v24 = vadd.f32 %v2940_v23, %v4470_v2 }
 0xf79   : > { %2946 = vst [vmem:[%s4778_s24 + $0x8] sm:$0xff] %v2944_v24 }
 0xf7a PF: > { %s27_s22 = sadd.s32 1, %s3946_s22   ;;  %s4783_s0 = sld [smem:[#allocation9_spill]] }
 0xf7b   : > { %p24_p11 = scmp.ge.s32.totalorder %s27_s22, 4   ;;  %s4784_s19 = sld [smem:[#allocation11_spill]] }
 0xf7c   : > { %s4785_s3 = sld [smem:[#allocation10_spill]]  ;;  %s4786_s17 = smov %s3930_s18 }
 0xf7d   : > { %s4788_s20 = smov %s3942_s21 }
 0xf7e   :  { %26 = sbr.rel (!%p24_p11) target bundleno = 14 (0xe), region = 156 }
 0xf80   : > { %s4787_s18 = smov %s4783_s0 }
 0xf82   : > { %s4789_s21 = smov %s4785_s3 }
 0xf83   :  { %2969 = vsyncpa [#allocation3], 1 }
 0xf84   :  { %2971 = vsyncpa [#allocation3 + $0x1], 1 }
 0xf85   :  { %2972 = vsyncpa [#allocation5], 1 }
 0xf86   :  { %2974 = vsyncpa [#allocation5 + $0x1], 1 }

</bundles_post_ra>
